<compile_context>
chip_gen: v7x
topology: tpu7x:2x2x1
jax: 0.10.0
libtpu: 0.0.40
codegen_flags: <defaults>
</compile_context>

<pallas_src>
import math
from functools import partial

import jax
import jax.numpy as jnp
from jax import lax
from jax.experimental import pallas as pl
from jax.experimental.pallas import tpu as pltpu

_INV_SQRT2 = 1.0 / math.sqrt(2.0)


def _gelu_exact(x):
    """0.5*x*(1+erf(x/sqrt(2))) via the Abramowitz&Stegun 7.1.26 erf polynomial
    (|abs err| < 1.5e-7).  The divide goes to the EUP reciprocal slot and the
    sign handling is a single select of the two half-range expressions."""
    a1, a2, a3, a4, a5 = 0.254829592, -0.284496736, 1.421413741, -1.453152027, 1.061405429
    p = 0.3275911
    z = x * _INV_SQRT2
    az = jnp.abs(z)
    t = pl.reciprocal(1.0 + p * az, approx=True)
    poly = t * (a1 + t * (a2 + t * (a3 + t * (a4 + t * a5))))
    pe = poly * jnp.exp(-az * az)                  # = 1 - erf(|z|)
    one_plus_erf = jnp.where(z >= 0.0, 2.0 - pe, pe)
    return 0.5 * x * one_plus_erf


def _plan_slabs(H, S, P):
    """Static H-slab plan: (starts, sizes, S).  Interior slabs all have size S;
    a tail shorter than P rows is merged into the previous slab so every slab
    is at least P rows tall (interior windows then never need padding)."""
    S = max(min(S, H), 1)
    starts = list(range(0, H, S))
    sizes = [min(S, H - s) for s in starts]
    if len(sizes) >= 2 and sizes[-1] < P:
        sizes[-2] += sizes[-1]
        starts.pop()
        sizes.pop()
    return starts, sizes, S


def _lpi_kernel(x_ref, pp_ref, out_ref, y_ref, *, K, H, W, S, eps):
    P = K // 2
    B, _, _, C = out_ref.shape
    cdt = y_ref.dtype                                # compute dtype (f32 or bf16)
    inv_n = 1.0 / float(B * H * W)
    starts, sizes, S = _plan_slabs(H, S, P)
    n = len(starts)

    # ---- packed per-channel parameters: one (2*K*K+4, C) block, sliced once ----
    pp = pp_ref[...]

    def prow(r, dt):
        return pp[r:r + 1, :].reshape(1, 1, 1, C).astype(dt)

    w0 = [prow(i, cdt) for i in range(K * K)]
    b0 = prow(K * K, cdt)
    gamma = prow(K * K + 1, jnp.float32)
    beta = prow(K * K + 2, jnp.float32)
    w1 = [prow(K * K + 3 + i, cdt) for i in range(K * K)]
    b1 = prow(2 * K * K + 3, cdt)

    # Lane-invariant column-validity masks for the rolled (W-shifted) taps.
    w_idx = lax.broadcasted_iota(jnp.int32, (1, 1, W, C), 2)
    w_ok = {dj: ((w_idx + dj) >= 0) & ((w_idx + dj) < W)
            for dj in range(-P, P + 1) if dj != 0}

    def dwconv(win, taps, bias, Sw):
        # win: (B, Sw + 2P, W, C) with the conv zero-padding rows already in
        # place.  H shifts are value slices; W shifts use the XLU roll + mask.
        acc = None
        for j in range(K):
            dj = j - P
            col = None
            for i in range(K):
                term = win[:, i:i + Sw, :, :] * taps[i * K + j]
                col = term if col is None else col + term
            if dj != 0:
                col = pltpu.roll(col, shift=(-dj) % W, axis=2)
                col = jnp.where(w_ok[dj], col, 0.0)
            acc = col if acc is None else acc + col
        return acc + bias

    def window(src_ref, s0, Sw, pad_top, pad_bot, fn=None):
        # Rows [s0 - P, s0 + Sw + P) of src_ref with out-of-image rows replaced
        # by zeros.  pad_top/pad_bot are static Python bools; interior slabs
        # (dynamic s0) never pad, so no masks or dynamic concats are needed.
        lo = P if pad_top else 0
        hi = P if pad_bot else 0
        core = src_ref[:, pl.ds(s0 - P + lo, Sw + 2 * P - lo - hi), :, :].astype(cdt)
        if fn is not None:
            core = fn(core)
        if (pad_top or pad_bot) and P > 0:
            z = jnp.zeros((B, P, W, C), cdt)
            parts = ([z] if pad_top else []) + [core] + ([z] if pad_bot else [])
            core = jnp.concatenate(parts, axis=1)
        return core

    # ---- pass 1: depthwise conv0 + exact GELU per slab; accumulate BN sums;
    #      stash the pre-BN activations in the VMEM scratch ----
    def pass1(s0, Sw, pad_top, pad_bot, carry):
        y = _gelu_exact(
            dwconv(window(x_ref, s0, Sw, pad_top, pad_bot), w0, b0, Sw)
            .astype(jnp.float32))
        y_ref[:, pl.ds(s0, Sw), :, :] = y.astype(cdt)
        s_acc, q_acc = carry
        return (s_acc + jnp.sum(y, axis=(0, 1, 2), keepdims=True),
                q_acc + jnp.sum(y * y, axis=(0, 1, 2), keepdims=True))

    zc = jnp.zeros((1, 1, 1, C), jnp.float32)
    carry = pass1(0, sizes[0], True, n == 1, (zc, zc))
    if n > 2:
        carry = lax.fori_loop(
            1, n - 1, lambda i, c: pass1(i * S, S, False, False, c), carry)
    if n >= 2:
        carry = pass1(starts[-1], sizes[-1], False, True, carry)
    s_sum, q_sum = carry

    # ---- BatchNorm2d (training-mode batch stats, biased variance) folded into
    #      one per-channel scale/shift ----
    mean = s_sum * inv_n
    var = jnp.maximum(q_sum * inv_n - mean * mean, 0.0)
    scale = gamma * lax.rsqrt(var + eps)
    shift = beta - mean * scale
    scale_c = scale.astype(cdt)
    shift_c = shift.astype(cdt)

    # ---- pass 2: fused normalize + depthwise conv1 per slab ----
    def pass2(s0, Sw, pad_top, pad_bot):
        win = window(y_ref, s0, Sw, pad_top, pad_bot,
                     fn=lambda c: c * scale_c + shift_c)
        out_ref[:, pl.ds(s0, Sw), :, :] = dwconv(win, w1, b1, Sw).astype(out_ref.dtype)

    pass2(0, sizes[0], True, n == 1)
    if n > 2:
        def _body2(i, c):
            pass2(i * S, S, False, False)
            return c
        lax.fori_loop(1, n - 1, _body2, 0)
    if n >= 2:
        pass2(starts[-1], sizes[-1], False, True)


def local_patch_interaction(x, pH, pW, params, *, kernel_size=3, eps=1e-5,
                            slab_rows=8, compute_dtype=jnp.float32,
                            c_block=None):
    """x: (B, pH*pW, C) -> (B, pH*pW, C).  Matches LocalPatchInteraction.forward
    with BatchNorm in training mode (batch statistics)."""
    B, N, C = x.shape
    assert N == pH * pW
    K = kernel_size
    P = K // 2
    R = 2 * K * K + 4
    S = max(min(max(slab_rows, P), pH), 1)
    cdt_size = jnp.dtype(compute_dtype).itemsize
    in_size = jnp.dtype(x.dtype).itemsize

    # --- generation-aware VMEM budget (128 MiB on v5e/v6e, 64 MiB/TC on v7x) ---
    try:
        cap = int(getattr(pltpu.get_tpu_info(), "vmem_capacity_bytes", 64 * 2 ** 20))
    except Exception:
        cap = 64 * 2 ** 20

    def working_bytes(cb):
        img = B * pH * pW * cb * in_size           # one pipelined image block
        ybuf = B * pH * pW * cb * cdt_size         # pre-BN activation scratch
        slab = 6 * B * (S + 2 * P) * pW * cb * 4   # per-slab elementwise temporaries
        return 4 * img + ybuf + slab + 2 * R * cb * 4

    if c_block is None:
        # Bigger channel blocks amortize per-step overhead on 128-MiB parts.
        c_block = 256 if (C % 256 == 0 and cap >= 96 * 2 ** 20
                          and working_bytes(256) <= 0.45 * cap) else 128

    Cp = -(-C // c_block) * c_block
    dC = Cp - C
    n_c = Cp // c_block
    # TODO(synk): for n_c == 1 (C <= 128) only one v7x TensorCore is fed; a
    # two-phase BN (stats kernel + conv kernel) would unlock a spatial/batch
    # parallel grid axis for megacore.

    x_nhwc = x.reshape(B, pH, pW, C)
    pp = jnp.concatenate([
        params["w0"].reshape(K * K, C),
        params["b0"].reshape(1, C),
        params["gamma"].reshape(1, C),
        params["beta"].reshape(1, C),
        params["w1"].reshape(K * K, C),
        params["b1"].reshape(1, C),
    ], axis=0).astype(jnp.float32)
    if dC:
        x_nhwc = jnp.pad(x_nhwc, ((0, 0), (0, 0), (0, 0), (0, dC)))
        pp = jnp.pad(pp, ((0, 0), (0, dC)))

    img_block = (B, pH, pW, c_block)
    img_map = lambda c: (0, 0, 0, c)
    working = working_bytes(c_block)
    if working > 0.7 * cap:
        # VMEM-tight (e.g. v7x at large B*H*W): single-buffer the output block.
        out_spec = pl.BlockSpec(img_block, img_map, pipeline_mode=pl.Buffered(1))
    else:
        out_spec = pl.BlockSpec(img_block, img_map)
    vmem_limit = int(min(0.85 * cap, max(32 * 2 ** 20, 1.25 * working)))

    cost = pl.CostEstimate(
        flops=(4 * K * K + 30) * B * pH * pW * Cp,
        transcendentals=2 * B * pH * pW * Cp,
        bytes_accessed=(2 * B * pH * pW * Cp + R * Cp) * 4,
    )

    out_nhwc = pl.pallas_call(
        partial(_lpi_kernel, K=K, H=pH, W=pW, S=S, eps=eps),
        out_shape=jax.ShapeDtypeStruct((B, pH, pW, Cp), x.dtype),
        grid_spec=pltpu.PrefetchScalarGridSpec(
            num_scalar_prefetch=0,
            grid=(n_c,),
            in_specs=[pl.BlockSpec(img_block, img_map),
                      pl.BlockSpec((R, c_block), lambda c: (0, c))],
            out_specs=out_spec,
            scratch_shapes=[pltpu.VMEM((B, pH, pW, c_block), compute_dtype)],
        ),
        compiler_params=pltpu.CompilerParams(
            dimension_semantics=("parallel",),
            vmem_limit_bytes=vmem_limit,
        ),
        cost_estimate=cost,
    )(x_nhwc, pp)

    if dC:
        out_nhwc = out_nhwc[..., :C]
    return out_nhwc.reshape(B, pH * pW, C)


def init_params(key, channels, kernel_size=3):
    k0, k1, k2, k3 = jax.random.split(key, 4)
    K = kernel_size
    # Depthwise conv taps kept as (K, K, C) for the NHWC kernel.  (Importing
    # real PyTorch weights of shape (C, 1, K, K) requires w.transpose(2, 3, 0).)
    return {
        "w0": 0.1 * jax.random.normal(k0, (K, K, channels), jnp.float32),
        "b0": 0.1 * jax.random.normal(k1, (1, channels), jnp.float32),
        "gamma": jnp.ones((1, channels), jnp.float32),   # BatchNorm affine init
        "beta": jnp.zeros((1, channels), jnp.float32),
        "w1": 0.1 * jax.random.normal(k2, (K, K, channels), jnp.float32),
        "b1": 0.1 * jax.random.normal(k3, (1, channels), jnp.float32),
    }


# ---------- pure-JAX reference (PyTorch semantics) for a numerical self-check ----------
def _ref_dwconv(img, w, b):
    # Plain zero-padded depthwise cross-correlation (PyTorch Conv2d semantics).
    K = w.shape[0]
    P = K // 2
    H, W = img.shape[1], img.shape[2]
    pad = jnp.pad(img, ((0, 0), (P, P), (P, P), (0, 0)))
    out = jnp.zeros_like(img)
    for i in range(K):
        for j in range(K):
            out = out + pad[:, i:i + H, j:j + W, :] * w[i, j].reshape(1, 1, 1, -1)
    return out + b.reshape(1, 1, 1, -1)


def _reference(x, pH, pW, params, eps=1e-5):
    B, N, C = x.shape
    img = x.reshape(B, pH, pW, C)
    y = _ref_dwconv(img, params["w0"], params["b0"])
    y = jax.nn.gelu(y, approximate=False)
    mean = jnp.mean(y, axis=(0, 1, 2), keepdims=True)
    var = jnp.mean((y - mean) ** 2, axis=(0, 1, 2), keepdims=True)   # biased, like BN
    y = (y - mean) / jnp.sqrt(var + eps) * params["gamma"].reshape(1, 1, 1, C) \
        + params["beta"].reshape(1, 1, 1, C)
    y = _ref_dwconv(y, params["w1"], params["b1"])
    return y.reshape(B, pH * pW, C)


if __name__ == "__main__":
    B, pH, pW, C = 2, 8, 8, 16
    key = jax.random.PRNGKey(0)
    kx, kp = jax.random.split(key)

    x = jax.random.normal(kx, (B, pH * pW, C), jnp.float32)
    params = init_params(kp, C, kernel_size=3)

    out = local_patch_interaction(x, pH, pW, params)
    jax.block_until_ready(out)
    assert out.shape == (B, pH * pW, C)

    ref = _reference(x, pH, pW, params)
    err = float(jnp.max(jnp.abs(out - ref)))
    assert err < 3e-2, f"max abs error vs reference: {err}"
    print("KERNEL_OK")
</pallas_src>

<mosaic_0001>
module attributes {stable_mosaic.version = 11 : i64} {
  func.func @_lpi_kernel(%arg0: i32, %arg1: memref<2x8x8x128xf32, #tpu.memory_space<vmem>>, %arg2: memref<22x128xf32, #tpu.memory_space<vmem>>, %arg3: memref<2x8x8x128xf32, #tpu.memory_space<vmem>>, %arg4: memref<2x8x8x128xf32, #tpu.memory_space<vmem>>) attributes {dimension_semantics = [#tpu.dimension_semantics<parallel>], iteration_bounds = array<i64: 1>, scalar_prefetch = 0 : i64, scratch_operands = 1 : i64, tpu.core_type = #tpu.core_type<tc>, window_params = [{transform_indices = @transform_0, window_bounds = array<i64: 2, 8, 8, 128>}, {transform_indices = @transform_1, window_bounds = array<i64: 22, 128>}, {transform_indices = @transform_2, window_bounds = array<i64: 2, 8, 8, 128>}]} {
    %c0 = arith.constant 0 : index
    %c0_0 = arith.constant 0 : index
    %0 = vector.load %arg2[%c0, %c0_0] : memref<22x128xf32, #tpu.memory_space<vmem>>, vector<22x128xf32>
    %1 = vector.extract_strided_slice %0 {offsets = [0, 0], sizes = [1, 128], strides = [1, 1]} : vector<22x128xf32> to vector<1x128xf32>
    %2 = vector.shape_cast %1 : vector<1x128xf32> to vector<1x1x1x128xf32>
    %3 = vector.extract_strided_slice %0 {offsets = [1, 0], sizes = [1, 128], strides = [1, 1]} : vector<22x128xf32> to vector<1x128xf32>
    %4 = vector.shape_cast %3 : vector<1x128xf32> to vector<1x1x1x128xf32>
    %5 = vector.extract_strided_slice %0 {offsets = [2, 0], sizes = [1, 128], strides = [1, 1]} : vector<22x128xf32> to vector<1x128xf32>
    %6 = vector.shape_cast %5 : vector<1x128xf32> to vector<1x1x1x128xf32>
    %7 = vector.extract_strided_slice %0 {offsets = [3, 0], sizes = [1, 128], strides = [1, 1]} : vector<22x128xf32> to vector<1x128xf32>
    %8 = vector.shape_cast %7 : vector<1x128xf32> to vector<1x1x1x128xf32>
    %9 = vector.extract_strided_slice %0 {offsets = [4, 0], sizes = [1, 128], strides = [1, 1]} : vector<22x128xf32> to vector<1x128xf32>
    %10 = vector.shape_cast %9 : vector<1x128xf32> to vector<1x1x1x128xf32>
    %11 = vector.extract_strided_slice %0 {offsets = [5, 0], sizes = [1, 128], strides = [1, 1]} : vector<22x128xf32> to vector<1x128xf32>
    %12 = vector.shape_cast %11 : vector<1x128xf32> to vector<1x1x1x128xf32>
    %13 = vector.extract_strided_slice %0 {offsets = [6, 0], sizes = [1, 128], strides = [1, 1]} : vector<22x128xf32> to vector<1x128xf32>
    %14 = vector.shape_cast %13 : vector<1x128xf32> to vector<1x1x1x128xf32>
    %15 = vector.extract_strided_slice %0 {offsets = [7, 0], sizes = [1, 128], strides = [1, 1]} : vector<22x128xf32> to vector<1x128xf32>
    %16 = vector.shape_cast %15 : vector<1x128xf32> to vector<1x1x1x128xf32>
    %17 = vector.extract_strided_slice %0 {offsets = [8, 0], sizes = [1, 128], strides = [1, 1]} : vector<22x128xf32> to vector<1x128xf32>
    %18 = vector.shape_cast %17 : vector<1x128xf32> to vector<1x1x1x128xf32>
    %19 = vector.extract_strided_slice %0 {offsets = [9, 0], sizes = [1, 128], strides = [1, 1]} : vector<22x128xf32> to vector<1x128xf32>
    %20 = vector.shape_cast %19 : vector<1x128xf32> to vector<1x1x1x128xf32>
    %21 = vector.extract_strided_slice %0 {offsets = [10, 0], sizes = [1, 128], strides = [1, 1]} : vector<22x128xf32> to vector<1x128xf32>
    %22 = vector.shape_cast %21 : vector<1x128xf32> to vector<1x1x1x128xf32>
    %23 = vector.extract_strided_slice %0 {offsets = [11, 0], sizes = [1, 128], strides = [1, 1]} : vector<22x128xf32> to vector<1x128xf32>
    %24 = vector.shape_cast %23 : vector<1x128xf32> to vector<1x1x1x128xf32>
    %25 = vector.extract_strided_slice %0 {offsets = [12, 0], sizes = [1, 128], strides = [1, 1]} : vector<22x128xf32> to vector<1x128xf32>
    %26 = vector.shape_cast %25 : vector<1x128xf32> to vector<1x1x1x128xf32>
    %27 = vector.extract_strided_slice %0 {offsets = [13, 0], sizes = [1, 128], strides = [1, 1]} : vector<22x128xf32> to vector<1x128xf32>
    %28 = vector.shape_cast %27 : vector<1x128xf32> to vector<1x1x1x128xf32>
    %29 = vector.extract_strided_slice %0 {offsets = [14, 0], sizes = [1, 128], strides = [1, 1]} : vector<22x128xf32> to vector<1x128xf32>
    %30 = vector.shape_cast %29 : vector<1x128xf32> to vector<1x1x1x128xf32>
    %31 = vector.extract_strided_slice %0 {offsets = [15, 0], sizes = [1, 128], strides = [1, 1]} : vector<22x128xf32> to vector<1x128xf32>
    %32 = vector.shape_cast %31 : vector<1x128xf32> to vector<1x1x1x128xf32>
    %33 = vector.extract_strided_slice %0 {offsets = [16, 0], sizes = [1, 128], strides = [1, 1]} : vector<22x128xf32> to vector<1x128xf32>
    %34 = vector.shape_cast %33 : vector<1x128xf32> to vector<1x1x1x128xf32>
    %35 = vector.extract_strided_slice %0 {offsets = [17, 0], sizes = [1, 128], strides = [1, 1]} : vector<22x128xf32> to vector<1x128xf32>
    %36 = vector.shape_cast %35 : vector<1x128xf32> to vector<1x1x1x128xf32>
    %37 = vector.extract_strided_slice %0 {offsets = [18, 0], sizes = [1, 128], strides = [1, 1]} : vector<22x128xf32> to vector<1x128xf32>
    %38 = vector.shape_cast %37 : vector<1x128xf32> to vector<1x1x1x128xf32>
    %39 = vector.extract_strided_slice %0 {offsets = [19, 0], sizes = [1, 128], strides = [1, 1]} : vector<22x128xf32> to vector<1x128xf32>
    %40 = vector.shape_cast %39 : vector<1x128xf32> to vector<1x1x1x128xf32>
    %41 = vector.extract_strided_slice %0 {offsets = [20, 0], sizes = [1, 128], strides = [1, 1]} : vector<22x128xf32> to vector<1x128xf32>
    %42 = vector.shape_cast %41 : vector<1x128xf32> to vector<1x1x1x128xf32>
    %43 = vector.extract_strided_slice %0 {offsets = [21, 0], sizes = [1, 128], strides = [1, 1]} : vector<22x128xf32> to vector<1x128xf32>
    %44 = vector.shape_cast %43 : vector<1x128xf32> to vector<1x1x1x128xf32>
    %45 = tpu.iota {dimensions = array<i32: 2>} : vector<1x1x8x128xi32>
    %c-1_i32 = arith.constant -1 : i32
    %46 = vector.broadcast %c-1_i32 : i32 to vector<1x1x8x128xi32>
    %47 = arith.addi %45, %46 : vector<1x1x8x128xi32>
    %c0_i32 = arith.constant 0 : i32
    %48 = vector.broadcast %c0_i32 : i32 to vector<1x1x8x128xi32>
    %49 = arith.cmpi sge, %47, %48 : vector<1x1x8x128xi32>
    %c-1_i32_1 = arith.constant -1 : i32
    %50 = vector.broadcast %c-1_i32_1 : i32 to vector<1x1x8x128xi32>
    %51 = arith.addi %45, %50 : vector<1x1x8x128xi32>
    %c8_i32 = arith.constant 8 : i32
    %52 = vector.broadcast %c8_i32 : i32 to vector<1x1x8x128xi32>
    %53 = arith.cmpi slt, %51, %52 : vector<1x1x8x128xi32>
    %54 = arith.andi %49, %53 : vector<1x1x8x128xi1>
    %c1_i32 = arith.constant 1 : i32
    %55 = vector.broadcast %c1_i32 : i32 to vector<1x1x8x128xi32>
    %56 = arith.addi %45, %55 : vector<1x1x8x128xi32>
    %c0_i32_2 = arith.constant 0 : i32
    %57 = vector.broadcast %c0_i32_2 : i32 to vector<1x1x8x128xi32>
    %58 = arith.cmpi sge, %56, %57 : vector<1x1x8x128xi32>
    %c1_i32_3 = arith.constant 1 : i32
    %59 = vector.broadcast %c1_i32_3 : i32 to vector<1x1x8x128xi32>
    %60 = arith.addi %45, %59 : vector<1x1x8x128xi32>
    %c8_i32_4 = arith.constant 8 : i32
    %61 = vector.broadcast %c8_i32_4 : i32 to vector<1x1x8x128xi32>
    %62 = arith.cmpi slt, %60, %61 : vector<1x1x8x128xi32>
    %63 = arith.andi %58, %62 : vector<1x1x8x128xi1>
    %cst = arith.constant 0.000000e+00 : f32
    %64 = vector.broadcast %cst : f32 to vector<1x1x1x128xf32>
    %c0_5 = arith.constant 0 : index
    %c0_6 = arith.constant 0 : index
    %c0_7 = arith.constant 0 : index
    %c0_8 = arith.constant 0 : index
    %65 = vector.load %arg1[%c0_5, %c0_6, %c0_7, %c0_8] : memref<2x8x8x128xf32, #tpu.memory_space<vmem>>, vector<2x8x8x128xf32>
    %cst_9 = arith.constant 0.000000e+00 : f32
    %66 = vector.broadcast %cst_9 : f32 to vector<2x1x8x128xf32>
    %67 = tpu.concatenate %66, %65, %66 in 1 : vector<2x1x8x128xf32>, vector<2x8x8x128xf32>, vector<2x1x8x128xf32> -> vector<2x10x8x128xf32>
    %68 = vector.extract_strided_slice %67 {offsets = [0, 0, 0, 0], sizes = [2, 8, 8, 128], strides = [1, 1, 1, 1]} : vector<2x10x8x128xf32> to vector<2x8x8x128xf32>
    %69 = vector.broadcast %2 : vector<1x1x1x128xf32> to vector<2x8x8x128xf32>
    %70 = arith.mulf %68, %69 : vector<2x8x8x128xf32>
    %71 = vector.extract_strided_slice %67 {offsets = [0, 1, 0, 0], sizes = [2, 8, 8, 128], strides = [1, 1, 1, 1]} : vector<2x10x8x128xf32> to vector<2x8x8x128xf32>
    %72 = vector.broadcast %8 : vector<1x1x1x128xf32> to vector<2x8x8x128xf32>
    %73 = arith.mulf %71, %72 : vector<2x8x8x128xf32>
    %74 = arith.addf %70, %73 : vector<2x8x8x128xf32>
    %75 = vector.extract_strided_slice %67 {offsets = [0, 2, 0, 0], sizes = [2, 8, 8, 128], strides = [1, 1, 1, 1]} : vector<2x10x8x128xf32> to vector<2x8x8x128xf32>
    %76 = vector.broadcast %14 : vector<1x1x1x128xf32> to vector<2x8x8x128xf32>
    %77 = arith.mulf %75, %76 : vector<2x8x8x128xf32>
    %78 = arith.addf %74, %77 : vector<2x8x8x128xf32>
    %c1_i32_10 = arith.constant 1 : i32
    %79 = tpu.dynamic_rotate %78 by %c1_i32_10 dim 2 : vector<2x8x8x128xf32>, i32 -> vector<2x8x8x128xf32>
    %cst_11 = arith.constant 0.000000e+00 : f32
    %80 = vector.shape_cast %54 : vector<1x1x8x128xi1> to vector<1x1x8x128xi1>
    %81 = vector.broadcast %80 : vector<1x1x8x128xi1> to vector<2x8x8x128xi1>
    %82 = vector.broadcast %cst_11 : f32 to vector<2x8x8x128xf32>
    %83 = arith.select %81, %79, %82 : vector<2x8x8x128xi1>, vector<2x8x8x128xf32>
    %84 = vector.extract_strided_slice %67 {offsets = [0, 0, 0, 0], sizes = [2, 8, 8, 128], strides = [1, 1, 1, 1]} : vector<2x10x8x128xf32> to vector<2x8x8x128xf32>
    %85 = vector.broadcast %4 : vector<1x1x1x128xf32> to vector<2x8x8x128xf32>
    %86 = arith.mulf %84, %85 : vector<2x8x8x128xf32>
    %87 = vector.extract_strided_slice %67 {offsets = [0, 1, 0, 0], sizes = [2, 8, 8, 128], strides = [1, 1, 1, 1]} : vector<2x10x8x128xf32> to vector<2x8x8x128xf32>
    %88 = vector.broadcast %10 : vector<1x1x1x128xf32> to vector<2x8x8x128xf32>
    %89 = arith.mulf %87, %88 : vector<2x8x8x128xf32>
    %90 = arith.addf %86, %89 : vector<2x8x8x128xf32>
    %91 = vector.extract_strided_slice %67 {offsets = [0, 2, 0, 0], sizes = [2, 8, 8, 128], strides = [1, 1, 1, 1]} : vector<2x10x8x128xf32> to vector<2x8x8x128xf32>
    %92 = vector.broadcast %16 : vector<1x1x1x128xf32> to vector<2x8x8x128xf32>
    %93 = arith.mulf %91, %92 : vector<2x8x8x128xf32>
    %94 = arith.addf %90, %93 : vector<2x8x8x128xf32>
    %95 = arith.addf %83, %94 : vector<2x8x8x128xf32>
    %96 = vector.extract_strided_slice %67 {offsets = [0, 0, 0, 0], sizes = [2, 8, 8, 128], strides = [1, 1, 1, 1]} : vector<2x10x8x128xf32> to vector<2x8x8x128xf32>
    %97 = vector.broadcast %6 : vector<1x1x1x128xf32> to vector<2x8x8x128xf32>
    %98 = arith.mulf %96, %97 : vector<2x8x8x128xf32>
    %99 = vector.extract_strided_slice %67 {offsets = [0, 1, 0, 0], sizes = [2, 8, 8, 128], strides = [1, 1, 1, 1]} : vector<2x10x8x128xf32> to vector<2x8x8x128xf32>
    %100 = vector.broadcast %12 : vector<1x1x1x128xf32> to vector<2x8x8x128xf32>
    %101 = arith.mulf %99, %100 : vector<2x8x8x128xf32>
    %102 = arith.addf %98, %101 : vector<2x8x8x128xf32>
    %103 = vector.extract_strided_slice %67 {offsets = [0, 2, 0, 0], sizes = [2, 8, 8, 128], strides = [1, 1, 1, 1]} : vector<2x10x8x128xf32> to vector<2x8x8x128xf32>
    %104 = vector.broadcast %18 : vector<1x1x1x128xf32> to vector<2x8x8x128xf32>
    %105 = arith.mulf %103, %104 : vector<2x8x8x128xf32>
    %106 = arith.addf %102, %105 : vector<2x8x8x128xf32>
    %c7_i32 = arith.constant 7 : i32
    %107 = tpu.dynamic_rotate %106 by %c7_i32 dim 2 : vector<2x8x8x128xf32>, i32 -> vector<2x8x8x128xf32>
    %cst_12 = arith.constant 0.000000e+00 : f32
    %108 = vector.shape_cast %63 : vector<1x1x8x128xi1> to vector<1x1x8x128xi1>
    %109 = vector.broadcast %108 : vector<1x1x8x128xi1> to vector<2x8x8x128xi1>
    %110 = vector.broadcast %cst_12 : f32 to vector<2x8x8x128xf32>
    %111 = arith.select %109, %107, %110 : vector<2x8x8x128xi1>, vector<2x8x8x128xf32>
    %112 = arith.addf %95, %111 : vector<2x8x8x128xf32>
    %113 = vector.broadcast %20 : vector<1x1x1x128xf32> to vector<2x8x8x128xf32>
    %114 = arith.addf %112, %113 : vector<2x8x8x128xf32>
    %cst_13 = arith.constant 0.707106769 : f32
    %115 = vector.broadcast %cst_13 : f32 to vector<2x8x8x128xf32>
    %116 = arith.mulf %114, %115 : vector<2x8x8x128xf32>
    %117 = math.absf %116 : vector<2x8x8x128xf32>
    %cst_14 = arith.constant 0.327591091 : f32
    %118 = vector.broadcast %cst_14 : f32 to vector<2x8x8x128xf32>
    %119 = arith.mulf %118, %117 : vector<2x8x8x128xf32>
    %cst_15 = arith.constant 1.000000e+00 : f32
    %120 = vector.broadcast %cst_15 : f32 to vector<2x8x8x128xf32>
    %121 = arith.addf %120, %119 : vector<2x8x8x128xf32>
    %122 = tpu.reciprocal %121 {approx = true} : vector<2x8x8x128xf32> -> vector<2x8x8x128xf32>
    %cst_16 = arith.constant 1.06140542 : f32
    %123 = vector.broadcast %cst_16 : f32 to vector<2x8x8x128xf32>
    %124 = arith.mulf %122, %123 : vector<2x8x8x128xf32>
    %cst_17 = arith.constant -1.45315206 : f32
    %125 = vector.broadcast %cst_17 : f32 to vector<2x8x8x128xf32>
    %126 = arith.addf %125, %124 : vector<2x8x8x128xf32>
    %127 = arith.mulf %122, %126 : vector<2x8x8x128xf32>
    %cst_18 = arith.constant 1.42141378 : f32
    %128 = vector.broadcast %cst_18 : f32 to vector<2x8x8x128xf32>
    %129 = arith.addf %128, %127 : vector<2x8x8x128xf32>
    %130 = arith.mulf %122, %129 : vector<2x8x8x128xf32>
    %cst_19 = arith.constant -0.284496725 : f32
    %131 = vector.broadcast %cst_19 : f32 to vector<2x8x8x128xf32>
    %132 = arith.addf %131, %130 : vector<2x8x8x128xf32>
    %133 = arith.mulf %122, %132 : vector<2x8x8x128xf32>
    %cst_20 = arith.constant 0.254829586 : f32
    %134 = vector.broadcast %cst_20 : f32 to vector<2x8x8x128xf32>
    %135 = arith.addf %134, %133 : vector<2x8x8x128xf32>
    %136 = arith.mulf %122, %135 : vector<2x8x8x128xf32>
    %cst_21 = arith.constant 0.000000e+00 : f32
    %137 = vector.broadcast %cst_21 : f32 to vector<2x8x8x128xf32>
    %138 = arith.subf %137, %117 : vector<2x8x8x128xf32>
    %139 = arith.mulf %138, %117 : vector<2x8x8x128xf32>
    %140 = math.exp %139 : vector<2x8x8x128xf32>
    %141 = arith.mulf %136, %140 : vector<2x8x8x128xf32>
    %cst_22 = arith.constant 0.000000e+00 : f32
    %142 = vector.broadcast %cst_22 : f32 to vector<2x8x8x128xf32>
    %143 = arith.cmpf oge, %116, %142 : vector<2x8x8x128xf32>
    %cst_23 = arith.constant 2.000000e+00 : f32
    %144 = vector.broadcast %cst_23 : f32 to vector<2x8x8x128xf32>
    %145 = arith.subf %144, %141 : vector<2x8x8x128xf32>
    %146 = arith.select %143, %145, %141 : vector<2x8x8x128xi1>, vector<2x8x8x128xf32>
    %cst_24 = arith.constant 5.000000e-01 : f32
    %147 = vector.broadcast %cst_24 : f32 to vector<2x8x8x128xf32>
    %148 = arith.mulf %147, %114 : vector<2x8x8x128xf32>
    %149 = arith.mulf %148, %146 : vector<2x8x8x128xf32>
    %c0_25 = arith.constant 0 : index
    %c0_26 = arith.constant 0 : index
    %c0_27 = arith.constant 0 : index
    %c0_28 = arith.constant 0 : index
    %150 = vector.load %arg4[%c0_25, %c0_26, %c0_27, %c0_28] : memref<2x8x8x128xf32, #tpu.memory_space<vmem>>, vector<2x8x8x128xf32>
    tpu.vector_store %arg4[%c0_25, %c0_26, %c0_27, %c0_28], %149 {strides = array<i32>} : memref<2x8x8x128xf32, #tpu.memory_space<vmem>>, vector<2x8x8x128xf32>,
    %cst_29 = arith.constant dense<0.000000e+00> : vector<128xf32>
    %151 = vector.multi_reduction <add>, %149, %cst_29 [0, 1, 2] : vector<2x8x8x128xf32> to vector<128xf32>
    %152 = vector.shape_cast %151 : vector<128xf32> to vector<1x1x1x128xf32>
    %153 = arith.addf %64, %152 : vector<1x1x1x128xf32>
    %154 = arith.mulf %149, %149 : vector<2x8x8x128xf32>
    %cst_30 = arith.constant dense<0.000000e+00> : vector<128xf32>
    %155 = vector.multi_reduction <add>, %154, %cst_30 [0, 1, 2] : vector<2x8x8x128xf32> to vector<128xf32>
    %156 = vector.shape_cast %155 : vector<128xf32> to vector<1x1x1x128xf32>
    %157 = arith.addf %64, %156 : vector<1x1x1x128xf32>
    %cst_31 = arith.constant 7.812500e-03 : f32
    %158 = vector.broadcast %cst_31 : f32 to vector<1x1x1x128xf32>
    %159 = arith.mulf %153, %158 : vector<1x1x1x128xf32>
    %cst_32 = arith.constant 7.812500e-03 : f32
    %160 = vector.broadcast %cst_32 : f32 to vector<1x1x1x128xf32>
    %161 = arith.mulf %157, %160 : vector<1x1x1x128xf32>
    %162 = arith.mulf %159, %159 : vector<1x1x1x128xf32>
    %163 = arith.subf %161, %162 : vector<1x1x1x128xf32>
    %cst_33 = arith.constant 0.000000e+00 : f32
    %164 = vector.broadcast %cst_33 : f32 to vector<1x1x1x128xf32>
    %165 = arith.maximumf %163, %164 : vector<1x1x1x128xf32>
    %cst_34 = arith.constant 9.99999974E-6 : f32
    %166 = vector.broadcast %cst_34 : f32 to vector<1x1x1x128xf32>
    %167 = arith.addf %165, %166 : vector<1x1x1x128xf32>
    %168 = math.rsqrt %167 : vector<1x1x1x128xf32>
    %169 = arith.mulf %22, %168 : vector<1x1x1x128xf32>
    %170 = arith.mulf %159, %169 : vector<1x1x1x128xf32>
    %171 = arith.subf %24, %170 : vector<1x1x1x128xf32>
    %c0_35 = arith.constant 0 : index
    %c0_36 = arith.constant 0 : index
    %c0_37 = arith.constant 0 : index
    %c0_38 = arith.constant 0 : index
    %172 = vector.load %arg4[%c0_35, %c0_36, %c0_37, %c0_38] : memref<2x8x8x128xf32, #tpu.memory_space<vmem>>, vector<2x8x8x128xf32>
    %173 = vector.broadcast %169 : vector<1x1x1x128xf32> to vector<2x8x8x128xf32>
    %174 = arith.mulf %172, %173 : vector<2x8x8x128xf32>
    %175 = vector.broadcast %171 : vector<1x1x1x128xf32> to vector<2x8x8x128xf32>
    %176 = arith.addf %174, %175 : vector<2x8x8x128xf32>
    %cst_39 = arith.constant 0.000000e+00 : f32
    %177 = vector.broadcast %cst_39 : f32 to vector<2x1x8x128xf32>
    %178 = tpu.concatenate %177, %176, %177 in 1 : vector<2x1x8x128xf32>, vector<2x8x8x128xf32>, vector<2x1x8x128xf32> -> vector<2x10x8x128xf32>
    %179 = vector.extract_strided_slice %178 {offsets = [0, 0, 0, 0], sizes = [2, 8, 8, 128], strides = [1, 1, 1, 1]} : vector<2x10x8x128xf32> to vector<2x8x8x128xf32>
    %180 = vector.broadcast %26 : vector<1x1x1x128xf32> to vector<2x8x8x128xf32>
    %181 = arith.mulf %179, %180 : vector<2x8x8x128xf32>
    %182 = vector.extract_strided_slice %178 {offsets = [0, 1, 0, 0], sizes = [2, 8, 8, 128], strides = [1, 1, 1, 1]} : vector<2x10x8x128xf32> to vector<2x8x8x128xf32>
    %183 = vector.broadcast %32 : vector<1x1x1x128xf32> to vector<2x8x8x128xf32>
    %184 = arith.mulf %182, %183 : vector<2x8x8x128xf32>
    %185 = arith.addf %181, %184 : vector<2x8x8x128xf32>
    %186 = vector.extract_strided_slice %178 {offsets = [0, 2, 0, 0], sizes = [2, 8, 8, 128], strides = [1, 1, 1, 1]} : vector<2x10x8x128xf32> to vector<2x8x8x128xf32>
    %187 = vector.broadcast %38 : vector<1x1x1x128xf32> to vector<2x8x8x128xf32>
    %188 = arith.mulf %186, %187 : vector<2x8x8x128xf32>
    %189 = arith.addf %185, %188 : vector<2x8x8x128xf32>
    %c1_i32_40 = arith.constant 1 : i32
    %190 = tpu.dynamic_rotate %189 by %c1_i32_40 dim 2 : vector<2x8x8x128xf32>, i32 -> vector<2x8x8x128xf32>
    %cst_41 = arith.constant 0.000000e+00 : f32
    %191 = vector.shape_cast %54 : vector<1x1x8x128xi1> to vector<1x1x8x128xi1>
    %192 = vector.broadcast %191 : vector<1x1x8x128xi1> to vector<2x8x8x128xi1>
    %193 = vector.broadcast %cst_41 : f32 to vector<2x8x8x128xf32>
    %194 = arith.select %192, %190, %193 : vector<2x8x8x128xi1>, vector<2x8x8x128xf32>
    %195 = vector.extract_strided_slice %178 {offsets = [0, 0, 0, 0], sizes = [2, 8, 8, 128], strides = [1, 1, 1, 1]} : vector<2x10x8x128xf32> to vector<2x8x8x128xf32>
    %196 = vector.broadcast %28 : vector<1x1x1x128xf32> to vector<2x8x8x128xf32>
    %197 = arith.mulf %195, %196 : vector<2x8x8x128xf32>
    %198 = vector.extract_strided_slice %178 {offsets = [0, 1, 0, 0], sizes = [2, 8, 8, 128], strides = [1, 1, 1, 1]} : vector<2x10x8x128xf32> to vector<2x8x8x128xf32>
    %199 = vector.broadcast %34 : vector<1x1x1x128xf32> to vector<2x8x8x128xf32>
    %200 = arith.mulf %198, %199 : vector<2x8x8x128xf32>
    %201 = arith.addf %197, %200 : vector<2x8x8x128xf32>
    %202 = vector.extract_strided_slice %178 {offsets = [0, 2, 0, 0], sizes = [2, 8, 8, 128], strides = [1, 1, 1, 1]} : vector<2x10x8x128xf32> to vector<2x8x8x128xf32>
    %203 = vector.broadcast %40 : vector<1x1x1x128xf32> to vector<2x8x8x128xf32>
    %204 = arith.mulf %202, %203 : vector<2x8x8x128xf32>
    %205 = arith.addf %201, %204 : vector<2x8x8x128xf32>
    %206 = arith.addf %194, %205 : vector<2x8x8x128xf32>
    %207 = vector.extract_strided_slice %178 {offsets = [0, 0, 0, 0], sizes = [2, 8, 8, 128], strides = [1, 1, 1, 1]} : vector<2x10x8x128xf32> to vector<2x8x8x128xf32>
    %208 = vector.broadcast %30 : vector<1x1x1x128xf32> to vector<2x8x8x128xf32>
    %209 = arith.mulf %207, %208 : vector<2x8x8x128xf32>
    %210 = vector.extract_strided_slice %178 {offsets = [0, 1, 0, 0], sizes = [2, 8, 8, 128], strides = [1, 1, 1, 1]} : vector<2x10x8x128xf32> to vector<2x8x8x128xf32>
    %211 = vector.broadcast %36 : vector<1x1x1x128xf32> to vector<2x8x8x128xf32>
    %212 = arith.mulf %210, %211 : vector<2x8x8x128xf32>
    %213 = arith.addf %209, %212 : vector<2x8x8x128xf32>
    %214 = vector.extract_strided_slice %178 {offsets = [0, 2, 0, 0], sizes = [2, 8, 8, 128], strides = [1, 1, 1, 1]} : vector<2x10x8x128xf32> to vector<2x8x8x128xf32>
    %215 = vector.broadcast %42 : vector<1x1x1x128xf32> to vector<2x8x8x128xf32>
    %216 = arith.mulf %214, %215 : vector<2x8x8x128xf32>
    %217 = arith.addf %213, %216 : vector<2x8x8x128xf32>
    %c7_i32_42 = arith.constant 7 : i32
    %218 = tpu.dynamic_rotate %217 by %c7_i32_42 dim 2 : vector<2x8x8x128xf32>, i32 -> vector<2x8x8x128xf32>
    %cst_43 = arith.constant 0.000000e+00 : f32
    %219 = vector.shape_cast %63 : vector<1x1x8x128xi1> to vector<1x1x8x128xi1>
    %220 = vector.broadcast %219 : vector<1x1x8x128xi1> to vector<2x8x8x128xi1>
    %221 = vector.broadcast %cst_43 : f32 to vector<2x8x8x128xf32>
    %222 = arith.select %220, %218, %221 : vector<2x8x8x128xi1>, vector<2x8x8x128xf32>
    %223 = arith.addf %206, %222 : vector<2x8x8x128xf32>
    %224 = vector.broadcast %44 : vector<1x1x1x128xf32> to vector<2x8x8x128xf32>
    %225 = arith.addf %223, %224 : vector<2x8x8x128xf32>
    %c0_44 = arith.constant 0 : index
    %c0_45 = arith.constant 0 : index
    %c0_46 = arith.constant 0 : index
    %c0_47 = arith.constant 0 : index
    %226 = vector.load %arg3[%c0_44, %c0_45, %c0_46, %c0_47] : memref<2x8x8x128xf32, #tpu.memory_space<vmem>>, vector<2x8x8x128xf32>
    tpu.vector_store %arg3[%c0_44, %c0_45, %c0_46, %c0_47], %225 {strides = array<i32>} : memref<2x8x8x128xf32, #tpu.memory_space<vmem>>, vector<2x8x8x128xf32>,
    return
  }
  func.func @transform_0(%arg0: i32) -> (i32, i32, i32, i32) {
    %c0_i32 = arith.constant 0 : i32
    %c0_i32_0 = arith.constant 0 : i32
    %c0_i32_1 = arith.constant 0 : i32
    %c0_i32_2 = arith.constant 0 : i32
    return %c0_i32, %c0_i32_0, %c0_i32_1, %arg0 : i32, i32, i32, i32
  }
  func.func @transform_1(%arg0: i32) -> (i32, i32) {
    %c0_i32 = arith.constant 0 : i32
    %c0_i32_0 = arith.constant 0 : i32
    return %c0_i32, %arg0 : i32, i32
  }
  func.func @transform_2(%arg0: i32) -> (i32, i32, i32, i32) {
    %c0_i32 = arith.constant 0 : i32
    %c0_i32_0 = arith.constant 0 : i32
    %c0_i32_1 = arith.constant 0 : i32
    %c0_i32_2 = arith.constant 0 : i32
    return %c0_i32, %c0_i32_0, %c0_i32_1, %arg0 : i32, i32, i32, i32
  }
}

</mosaic_0001>

<bundles_post_ra>
// kernel: tpu_custom_call.1
= control target key start
LH: loop header
LB: loop body
LE: loop exit
PB: predicated region body
PF: predicated region fallthrough
CT: control target
= control target key end

     0   :  { %7 = vsyncpa [#allocation4], 0  ;;  %s3151_s0 = inlined_call_operand.hbm [shape: f32[2,8,8,128], index: 0, kind: input, shape index: {}]   ;;  %s3152_s1 = inlined_call_operand.hbm [shape: f32[22,128], index: 1, kind: input, shape index: {}]   ;;  %s3153_s2 = inlined_call_operand.hbm [shape: f32[2,8,8,128], index: 2, kind: output, shape index: {}]  }
   0x1   :  { %8 = vsyncpa [#allocation7], 0 }
   0x2   :  { %9 = vsyncpa [#allocation5], 0  ;;  %s1552_s9 = smov [#allocation3]   ;;  %s1480_s13 = scalar_lea.hbm %s3151_s0, 2048 }
   0x3   :  { %s15_s10 = sshll.u32 %s1552_s9, 4  ;;  %p1481_p0 = scmp.ne.s32.totalorder %s3151_s0, %s1480_s13  ;;  %s16_s10 = int_to_ptr.vmem [resolvable:$true] %s15_s10 }
   0x4   :  { %p1484_p1 = scmp.lt.u32.totalorder %s1480_s13, %s3151_s0 }
   0x6   :  { %p1486_p2 = pnand %p1484_p1, %p1481_p0 }
   0x8   :  { %1489 = shalt.err (!%p1486_p2)
}
   0x9   :  { %s1490_s18 = scalar_lea.vmem %s16_s10, 2048  ;;  %p1495_p4 = scmp.lt.s32.totalorder %s16_s10, %s16_s10 }
   0xa   :  { %p1491_p3 = scmp.ne.s32.totalorder %s16_s10, %s1490_s18  ;;  %p1496_p5 = scmp.lt.s32.totalorder %s1490_s18, %s1490_s18 }
   0xc   :  { %p1497_p6 = por %p1496_p5, %p1495_p4 }
   0xe   :  { %p1498_p7 = pnand %p1497_p6, %p1491_p3 }
  0x10   :  { %1501 = shalt.err (!%p1498_p7)
}
  0x11   :  { %s1553_s19 = smov 128   ;;  %s1554_s20 = smov 8  }
  0x12   :  { %21 = dma.hbm_to_vmem [thread:$0]  %s3151_s0, 2048, %s16_s10, [#allocation4], %s1553_s19, %s1553_s19, %s1554_s20  }
  0x13   :  { %s1555_s23 = smov [#allocation6]   ;;  %s1502_s27 = scalar_lea.hbm %s3152_s1, 384 }
  0x14   :  { %s27_s24 = sshll.u32 %s1555_s23, 4  ;;  %p1503_p8 = scmp.ne.s32.totalorder %s3152_s1, %s1502_s27  ;;  %s28_s24 = int_to_ptr.vmem [resolvable:$true] %s27_s24 }
  0x15   :  { %p1506_p9 = scmp.lt.u32.totalorder %s1502_s27, %s3152_s1 }
  0x17   :  { %p1508_p10 = pnand %p1506_p9, %p1503_p8 }
  0x19   :  { %1511 = shalt.err (!%p1508_p10)
}
  0x1a   :  { %s1512_s4 = scalar_lea.vmem %s28_s24, 384  ;;  %p1517_p12 = scmp.lt.s32.totalorder %s28_s24, %s28_s24 }
  0x1b   :  { %p1513_p11 = scmp.ne.s32.totalorder %s28_s24, %s1512_s4  ;;  %p1518_p13 = scmp.lt.s32.totalorder %s1512_s4, %s1512_s4 }
  0x1d   :  { %p1519_p0 = por %p1518_p13, %p1517_p12 }
  0x1f   :  { %p1520_p1 = pnand %p1519_p0, %p1513_p11 }
  0x21   :  { %1523 = shalt.err (!%p1520_p1)
}
  0x22   :  { %33 = dma.hbm_to_vmem [thread:$0]  %s3152_s1, 384, %s28_s24, [#allocation7], %s1553_s19, %s1553_s19, %s1554_s20  }
  0x23   :  { %1546 = dma.done.wait [#allocation4], 2048  }
  0x24   :  { %1547 = vsyncadd [#allocation4], 4294965248 }
  0x25   :  { %1548 = dma.done.wait [#allocation7], 384  }
  0x26   :  { %1549 = vsyncadd [#allocation7], 4294966912  ;;  %v43_v0 = vlaneseq  ;;  %v40_v3 = vld [vmem:[#allocation6] sm:$0xff]  ;;  %v1633_v15 = vld [vmem:[#allocation3 + $0x8] sm:$0xff]  ;;  %s1556_s1 = smov [#allocation8]  }
  0x27   :  { %v1628_v13 = vld [vmem:[#allocation3] sm:$0xff]  ;;  %v1635_v16 = vld [vmem:[#allocation3 + $0x10] sm:$0xff]  ;;  %v1645_v20 = vld [vmem:[#allocation3 + $0x18] sm:$0xff]  ;;  %s1395_s6 = sshll.u32 %s1556_s1, 4  ;;  %s1396_s6 = int_to_ptr.vmem [resolvable:$true] %s1395_s6 }
  0x28   :  { %v1602_v1 = vshrl.u32 %v43_v0, 7  ;;  %3261 = vst [vmem:[#allocation20_spill] sm:$0xff] %v1628_v13  ;;  %v1647_v21 = vld [vmem:[#allocation3 + $0x20] sm:$0xff]  ;;  %v1649_v22 = vld [vmem:[#allocation3 + $0x28] sm:$0xff]  ;;  %v1664_v27 = vld [vmem:[#allocation3 + $0x30] sm:$0xff]  ;;  %s1524_s7 = scalar_lea.vmem %s1396_s6, 2048  ;;  %p1529_p3 = scmp.lt.s32.totalorder %s1396_s6, %s1396_s6 }
  0x29   :  { %v1666_v28 = vld [vmem:[#allocation3 + $0x38] sm:$0xff]  ;;  %v1668_v29 = vld [vmem:[#allocation3 + $0x40] sm:$0xff]  ;;  %v1673_v34 = vld [vmem:[#allocation3 + $0x48] sm:$0xff]  ;;  %p1525_p2 = scmp.ne.s32.totalorder %s1396_s6, %s1524_s7  ;;  %p1530_p4 = scmp.lt.s32.totalorder %s1524_s7, %s1524_s7 }
  0x2a   :  { %3253 = vst [vmem:[#allocation12_spill] sm:$0xff] %v1602_v1  ;;  %v1605_v2 = vsub.s32 0, %v1602_v1  ;;  %v1608_v4 = vsub.s32 3, %v1602_v1  ;;  %v3155_v5 = vsub.s32 6, %v1602_v1  ;;  %v1612_v6 = vsub.s32 1, %v1602_v1  ;;  %3268 = vst [vmem:[#allocation27_spill] sm:$0xff] %v1666_v28 }
  0x2b   :  { %v1615_v7 = vsub.s32 4, %v1602_v1  ;;  %v3154_v8 = vsub.s32 7, %v1602_v1  ;;  %v1619_v9 = vsub.s32 2, %v1602_v1  ;;  %v1622_v10 = vsub.s32 5, %v1602_v1  ;;  %3269 = vst [vmem:[#allocation28_spill] sm:$0xff] %v1668_v29  ;;  %v1675_v35 = vld [vmem:[#allocation3 + $0x50] sm:$0xff]  ;;  %p1531_p5 = por %p1530_p4, %p1529_p3 }
  0x2c   :  { %3254 = vst [vmem:[#allocation13_spill] sm:$0xff] %v1605_v2  ;;  %3255 = vst [vmem:[#allocation14_spill] sm:$0xff] %v1608_v4  ;;  %v72_v11 = vrot.slane %v40_v3, %v1605_v2  ;;  %v1626_v12 = vadd.s32 4294967295, %v1602_v1  ;;  %v1631_v14 = vadd.s32 1, %v1602_v1  ;;  %v91_v17 = vrot.slane %v40_v3, %v1608_v4  ;;  %v1677_v36 = vld [vmem:[#allocation3 + $0x58] sm:$0xff]  ;;  %v1683_v41 = vld [vmem:[#allocation3 + $0x60] sm:$0xff] }
  0x2d   :  { %3256 = vst [vmem:[#allocation15_spill] sm:$0xff] %v1612_v6  ;;  %3257 = vst [vmem:[#allocation16_spill] sm:$0xff] %v1615_v7  ;;  %v1640_v18 = vrot.slane %v40_v3, %v3155_v5  ;;  %v1643_v19 = vrot.slane %v40_v3, %v1612_v6  ;;  %v1652_v23 = vrot.slane %v40_v3, %v1615_v7  ;;  %v1685_v42 = vld [vmem:[#allocation3 + $0x68] sm:$0xff]  ;;  %v1687_v43 = vld [vmem:[#allocation3 + $0x70] sm:$0xff]  ;;  %p1532_p6 = pnand %p1531_p5, %p1525_p2 }
  0x2e   :  { %3258 = vst [vmem:[#allocation17_spill] sm:$0xff] %v1619_v9  ;;  %3259 = vst [vmem:[#allocation18_spill] sm:$0xff] %v1622_v10  ;;  %v1656_v24 = vrot.slane %v40_v3, %v3154_v8  ;;  %v1659_v25 = vrot.slane %v40_v3, %v1619_v9  ;;  %v1662_v26 = vrot.slane %v40_v3, %v1622_v10  ;;  %v73_v30 = vmul.f32 0.0, %v72_v11  ;;  %v1697_v52 = vld [vmem:[#allocation3 + $0x78] sm:$0xff] }
  0x2f   :  { %3260 = vst [vmem:[#allocation19_spill] sm:$0xff] %v1626_v12  ;;  %3262 = vst [vmem:[#allocation21_spill] sm:$0xff] %v1631_v14  ;;  %v74_v31 = vmul.f32 %v72_v11, %v1628_v13  ;;  %v75_v32 = vmul.f32 %v72_v11, %v1633_v15  ;;  %v76_v33 = vmul.f32 %v72_v11, %v1635_v16  ;;  %vm46_vm0 = vcmp.ge.s32.totalorder %v1626_v12, 0 }
  0x30   :  { %3263 = vst [vmem:[#allocation22_spill] sm:$0xff] %v1643_v19  ;;  %3264 = vst [vmem:[#allocation23_spill] sm:$0xff] %v1652_v23  ;;  %v77_v37 = vmul.f32 %v72_v11, %v1645_v20  ;;  %v78_v38 = vmul.f32 %v72_v11, %v1647_v21  ;;  %v79_v39 = vmul.f32 %v72_v11, %v1649_v22 }
  0x31   :  { %3265 = vst [vmem:[#allocation24_spill] sm:$0xff] %v1656_v24  ;;  %3266 = vst [vmem:[#allocation25_spill] sm:$0xff] %v1659_v25  ;;  %v80_v40 = vmul.f32 %v72_v11, %v1664_v27  ;;  %v81_v44 = vmul.f32 %v72_v11, %v1668_v29  ;;  %v82_v45 = vmul.f32 %v72_v11, %v1673_v34 }
  0x32   :  { %3267 = vst [vmem:[#allocation26_spill] sm:$0xff] %v1662_v26  ;;  %3270 = vst [vmem:[#allocation29_spill] sm:$0xff] %v1687_v43  ;;  %v83_v46 = vmul.f32 %v72_v11, %v1675_v35  ;;  %v84_v47 = vmul.f32 %v72_v11, %v1677_v36  ;;  %v85_v48 = vmul.f32 %v72_v11, %v1683_v41 }
  0x33   :  { %v86_v49 = vmul.f32 %v72_v11, %v1685_v42  ;;  %v87_v50 = vmul.f32 %v72_v11, %v1687_v43  ;;  %v92_v51 = vmul.f32 %v91_v17, %v1628_v13  ;;  %v93_v53 = vmul.f32 %v91_v17, %v1633_v15 }
  0x34   :  { %v94_v54 = vmul.f32 %v91_v17, %v1635_v16  ;;  %v95_v55 = vmul.f32 %v91_v17, %v1645_v20  ;;  %v96_v56 = vmul.f32 %v91_v17, %v1647_v21  ;;  %v97_v57 = vmul.f32 %v91_v17, %v1649_v22 }
  0x35   :  { %v98_v58 = vmul.f32 %v91_v17, %v1664_v27  ;;  %v99_v59 = vmul.f32 %v91_v17, %v1666_v28  ;;  %v100_v60 = vmul.f32 %v91_v17, %v1668_v29  ;;  %v101_v61 = vmul.f32 %v91_v17, %v1673_v34 }
  0x36   :  { %v102_v62 = vmul.f32 %v91_v17, %v1675_v35  ;;  %v103_v63 = vmul.f32 %v91_v17, %v1677_v36  ;;  %v104_v0 = vmul.f32 %v91_v17, %v1683_v41  ;;  %v105_v3 = vmul.f32 %v91_v17, %v1685_v42 }
  0x37   :  { %v106_v11 = vmul.f32 %v91_v17, %v1687_v43  ;;  %v107_v8 = vmul.f32 %v91_v17, %v1697_v52  ;;  %v108_v5 = vadd.f32 %v92_v51, %v73_v30  ;;  %v109_v1 = vadd.f32 %v93_v53, %v74_v31 }
  0x38   :  { %v110_v4 = vadd.f32 %v94_v54, %v75_v32  ;;  %v111_v10 = vadd.f32 %v95_v55, %v76_v33  ;;  %v112_v9 = vadd.f32 %v96_v56, %v77_v37  ;;  %v113_v7 = vadd.f32 %v97_v57, %v78_v38 }
  0x39   :  { %v114_v6 = vadd.f32 %v98_v58, %v79_v39  ;;  %v115_v14 = vadd.f32 %v99_v59, %v80_v40  ;;  %v116_v2 = vadd.f32 %v100_v60, %v73_v30  ;;  %v117_v26 = vadd.f32 %v101_v61, %v81_v44 }
  0x3a   :  { %v118_v25 = vadd.f32 %v102_v62, %v82_v45  ;;  %v119_v24 = vadd.f32 %v103_v63, %v83_v46  ;;  %v120_v23 = vadd.f32 %v104_v0, %v84_v47  ;;  %v121_v29 = vadd.f32 %v105_v3, %v85_v48 }
  0x3b   :  { %v122_v13 = vadd.f32 %v106_v11, %v86_v49  ;;  %v128_v19 = vmul.f32 %v1640_v18, %v1633_v15  ;;  %v129_v17 = vmul.f32 %v1640_v18, %v1635_v16  ;;  %v130_v31 = vmul.f32 %v1640_v18, %v1645_v20 }
  0x3c   :  { %v131_v30 = vmul.f32 %v1640_v18, %v1647_v21  ;;  %v132_v32 = vmul.f32 %v1640_v18, %v1649_v22  ;;  %v133_v33 = vmul.f32 %v1640_v18, %v1664_v27  ;;  %v134_v37 = vmul.f32 %v1640_v18, %v1666_v28 }
  0x3d   :  { %v135_v38 = vmul.f32 0.0, %v1640_v18  ;;  %v136_v39 = vmul.f32 %v1640_v18, %v1673_v34  ;;  %v137_v40 = vmul.f32 %v1640_v18, %v1675_v35  ;;  %v138_v44 = vmul.f32 %v1640_v18, %v1677_v36 }
  0x3e   :  { %v139_v45 = vmul.f32 %v1640_v18, %v1683_v41  ;;  %v140_v46 = vmul.f32 %v1640_v18, %v1685_v42  ;;  %v141_v47 = vmul.f32 %v1640_v18, %v1687_v43  ;;  %v123_v48 = vadd.f32 %v107_v8, %v87_v50 }
  0x3f   :  { %v142_v49 = vmul.f32 %v1640_v18, %v1697_v52  ;;  %v143_v51 = vadd.f32 %v128_v19, %v108_v5  ;;  %v144_v53 = vadd.f32 %v129_v17, %v109_v1  ;;  %v145_v54 = vadd.f32 %v130_v31, %v110_v4 }
  0x40   :  { %v146_v55 = vadd.f32 %v131_v30, %v111_v10  ;;  %v147_v56 = vadd.f32 %v132_v32, %v112_v9  ;;  %v148_v57 = vadd.f32 %v133_v33, %v113_v7  ;;  %v149_v58 = vadd.f32 %v134_v37, %v114_v6 }
  0x41   :  { %v150_v59 = vadd.f32 %v135_v38, %v115_v14  ;;  %v151_v60 = vadd.f32 %v136_v39, %v116_v2  ;;  %v152_v61 = vadd.f32 %v137_v40, %v117_v26  ;;  %v153_v62 = vadd.f32 %v138_v44, %v118_v25 }
  0x42   :  { %v154_v63 = vadd.f32 %v139_v45, %v119_v24  ;;  %v155_v0 = vadd.f32 %v140_v46, %v120_v23  ;;  %v156_v3 = vadd.f32 %v141_v47, %v121_v29  ;;  %v157_v11 = vadd.f32 %v142_v49, %v122_v13  ;;  %v3286_v45 = vld [vmem:[#allocation22_spill] sm:$0xff]  ;;  %v3287_v47 = vld [vmem:[#allocation20_spill] sm:$0xff] }
  0x43   :  { %v158_v28 = vadd.f32 %v135_v38, %v123_v48  ;;  %v159_v8 = vrot.slane %v143_v51, 7  ;;  %v160_v50 = vrot.slane %v144_v53, 7  ;;  %v161_v43 = vrot.slane %v145_v54, 7 }
  0x44   :  { %v162_v18 = vrot.slane %v146_v55, 7  ;;  %v163_v5 = vrot.slane %v147_v56, 7  ;;  %v164_v1 = vrot.slane %v148_v57, 7  ;;  %v165_v4 = vrot.slane %v149_v58, 7  ;;  %v3288_v57 = vld [vmem:[#allocation28_spill] sm:$0xff] }
  0x45   :  { %v166_v10 = vrot.slane %v150_v59, 7  ;;  %v167_v9 = vrot.slane %v151_v60, 7  ;;  %v168_v7 = vrot.slane %v152_v61, 7  ;;  %v169_v6 = vrot.slane %v153_v62, 7 }
  0x46   :  { %v170_v14 = vrot.slane %v154_v63, 7  ;;  %v171_v2 = vrot.slane %v155_v0, 7  ;;  %v172_v19 = vrot.slane %v156_v3, 7  ;;  %v173_v25 = vrot.slane %v157_v11, 7  ;;  %v3289_v0 = vld [vmem:[#allocation29_spill] sm:$0xff]  ;;  %v3290_v11 = vld [vmem:[#allocation23_spill] sm:$0xff] }
  0x47   :  { %v174_v24 = vrot.slane %v158_v28, 7  ;;  %v1746_v13 = vsel %vm46_vm0, %v159_v8, 0.0  ;;  %v1750_v23 = vsel %vm46_vm0, %v160_v50, 0.0  ;;  %v1754_v26 = vsel %vm46_vm0, %v161_v43, 0.0 }
  0x48   :  { %3271 = vst [vmem:[#allocation30_spill] sm:$0xff] %v1750_v23  ;;  %3272 = vst [vmem:[#allocation31_spill] sm:$0xff] %v1754_v26  ;;  %v1758_v29 = vsel %vm46_vm0, %v162_v18, 0.0  ;;  %v1762_v17 = vsel %vm46_vm0, %v163_v5, 0.0  ;;  %v1766_v28 = vsel %vm46_vm0, %v164_v1, 0.0  ;;  %v1770_v31 = vsel %vm46_vm0, %v165_v4, 0.0 }
  0x49   :  { %3273 = vst [vmem:[#allocation32_spill] sm:$0xff] %v1758_v29  ;;  %3274 = vst [vmem:[#allocation33_spill] sm:$0xff] %v1762_v17  ;;  %v1774_v43 = vsel %vm46_vm0, %v166_v10, 0.0  ;;  %v1778_v30 = vsel %vm46_vm0, %v167_v9, 0.0  ;;  %v1782_v32 = vsel %vm46_vm0, %v168_v7, 0.0  ;;  %v1786_v33 = vsel %vm46_vm0, %v169_v6, 0.0 }
  0x4a   :  { %3275 = vst [vmem:[#allocation34_spill] sm:$0xff] %v1766_v28  ;;  %3276 = vst [vmem:[#allocation35_spill] sm:$0xff] %v1770_v31  ;;  %v1790_v37 = vsel %vm46_vm0, %v170_v14, 0.0  ;;  %v1794_v38 = vsel %vm46_vm0, %v171_v2, 0.0  ;;  %v1798_v39 = vsel %vm46_vm0, %v172_v19, 0.0  ;;  %v1802_v40 = vsel %vm46_vm0, %v173_v25, 0.0 }
  0x4b   :  { %3277 = vst [vmem:[#allocation36_spill] sm:$0xff] %v1774_v43  ;;  %3278 = vst [vmem:[#allocation37_spill] sm:$0xff] %v1778_v30  ;;  %v1806_v44 = vsel %vm46_vm0, %v174_v24, 0.0  ;;  %v197_v46 = vmul.f32 0.0, %v3286_v45  ;;  %v198_v48 = vmul.f32 %v3286_v45, %v3287_v47  ;;  %v199_v49 = vmul.f32 %v3286_v45, %v1633_v15  ;;  %v3291_v9 = vld [vmem:[#allocation27_spill] sm:$0xff]  ;;  %v3292_v26 = vld [vmem:[#allocation24_spill] sm:$0xff] }
  0x4c   :  { %3279 = vst [vmem:[#allocation38_spill] sm:$0xff] %v1782_v32  ;;  %3280 = vst [vmem:[#allocation39_spill] sm:$0xff] %v1786_v33  ;;  %v200_v51 = vmul.f32 %v3286_v45, %v1635_v16  ;;  %v201_v53 = vmul.f32 %v3286_v45, %v1645_v20  ;;  %v202_v54 = vmul.f32 %v3286_v45, %v1647_v21 }
  0x4d   :  { %3281 = vst [vmem:[#allocation40_spill] sm:$0xff] %v1790_v37  ;;  %3282 = vst [vmem:[#allocation41_spill] sm:$0xff] %v1794_v38  ;;  %v203_v55 = vmul.f32 %v3286_v45, %v1649_v22  ;;  %v204_v56 = vmul.f32 %v3286_v45, %v1664_v27  ;;  %v205_v58 = vmul.f32 %v3286_v45, %v3288_v57 }
  0x4e   :  { %3283 = vst [vmem:[#allocation42_spill] sm:$0xff] %v1798_v39  ;;  %3284 = vst [vmem:[#allocation43_spill] sm:$0xff] %v1802_v40  ;;  %v206_v59 = vmul.f32 %v3286_v45, %v1673_v34  ;;  %v207_v60 = vmul.f32 %v3286_v45, %v1675_v35  ;;  %v208_v61 = vmul.f32 %v3286_v45, %v1677_v36 }
  0x4f   :  { %3285 = vst [vmem:[#allocation44_spill] sm:$0xff] %v1806_v44  ;;  %v209_v62 = vmul.f32 %v3286_v45, %v1683_v41  ;;  %v210_v63 = vmul.f32 %v3286_v45, %v1685_v42  ;;  %v211_v3 = vmul.f32 %v3286_v45, %v3289_v0  ;;  %v216_v8 = vmul.f32 %v3290_v11, %v3287_v47 }
  0x50   :  { %v217_v50 = vmul.f32 %v3290_v11, %v1633_v15  ;;  %v218_v18 = vmul.f32 %v3290_v11, %v1635_v16  ;;  %v219_v5 = vmul.f32 %v3290_v11, %v1645_v20  ;;  %v220_v1 = vmul.f32 %v3290_v11, %v1647_v21 }
  0x51   :  { %v221_v4 = vmul.f32 %v3290_v11, %v1649_v22  ;;  %v222_v10 = vmul.f32 %v3290_v11, %v1664_v27  ;;  %v223_v7 = vmul.f32 %v3290_v11, %v3291_v9  ;;  %v224_v6 = vmul.f32 %v3290_v11, %v3288_v57 }
  0x52   :  { %v225_v14 = vmul.f32 %v3290_v11, %v1673_v34  ;;  %v226_v2 = vmul.f32 %v3290_v11, %v1675_v35  ;;  %v227_v19 = vmul.f32 %v3290_v11, %v1677_v36  ;;  %v228_v25 = vmul.f32 %v3290_v11, %v1683_v41 }
  0x53   :  { %v229_v24 = vmul.f32 %v3290_v11, %v1685_v42  ;;  %v230_v45 = vmul.f32 %v3290_v11, %v3289_v0  ;;  %v231_v12 = vmul.f32 %v3290_v11, %v1697_v52  ;;  %v232_v57 = vadd.f32 %v216_v8, %v197_v46 }
  0x54   :  { %v233_v47 = vadd.f32 %v217_v50, %v198_v48  ;;  %v234_v44 = vadd.f32 %v218_v18, %v199_v49  ;;  %v235_v40 = vadd.f32 %v219_v5, %v200_v51  ;;  %v236_v39 = vadd.f32 %v220_v1, %v201_v53 }
  0x55   :  { %v237_v38 = vadd.f32 %v221_v4, %v202_v54  ;;  %v238_v37 = vadd.f32 %v222_v10, %v203_v55  ;;  %v239_v33 = vadd.f32 %v223_v7, %v204_v56  ;;  %v240_v32 = vadd.f32 %v224_v6, %v197_v46 }
  0x56   :  { %v241_v30 = vadd.f32 %v225_v14, %v205_v58  ;;  %v242_v43 = vadd.f32 %v226_v2, %v206_v59  ;;  %v243_v31 = vadd.f32 %v227_v19, %v207_v60  ;;  %v244_v28 = vadd.f32 %v228_v25, %v208_v61 }
  0x57   :  { %v245_v17 = vadd.f32 %v229_v24, %v209_v62  ;;  %v246_v29 = vadd.f32 %v230_v45, %v210_v63  ;;  %v252_v23 = vmul.f32 %v3292_v26, %v1633_v15  ;;  %v253_v11 = vmul.f32 %v3292_v26, %v1635_v16 }
  0x58   :  { %v254_v48 = vmul.f32 %v3292_v26, %v1645_v20  ;;  %v255_v49 = vmul.f32 %v3292_v26, %v1647_v21  ;;  %v256_v46 = vmul.f32 %v3292_v26, %v1649_v22  ;;  %v257_v51 = vmul.f32 %v3292_v26, %v1664_v27 }
  0x59   :  { %v258_v53 = vmul.f32 %v3292_v26, %v3291_v9  ;;  %v259_v54 = vmul.f32 0.0, %v3292_v26  ;;  %v260_v55 = vmul.f32 %v3292_v26, %v1673_v34  ;;  %v261_v56 = vmul.f32 %v3292_v26, %v1675_v35 }
  0x5a   :  { %v262_v58 = vmul.f32 %v3292_v26, %v1677_v36  ;;  %v263_v59 = vmul.f32 %v3292_v26, %v1683_v41  ;;  %v247_v60 = vadd.f32 %v231_v12, %v211_v3  ;;  %v264_v61 = vmul.f32 %v3292_v26, %v1685_v42 }
  0x5b   :  { %v265_v62 = vmul.f32 %v3292_v26, %v3289_v0  ;;  %v266_v63 = vmul.f32 %v3292_v26, %v1697_v52  ;;  %v267_v8 = vadd.f32 %v252_v23, %v232_v57  ;;  %v268_v50 = vadd.f32 %v253_v11, %v233_v47  ;;  %v3294_v26 = vld [vmem:[#allocation30_spill] sm:$0xff]  ;;  %v3312_v11 = vld [vmem:[#allocation39_spill] sm:$0xff] }
  0x5c   :  { %v269_v18 = vadd.f32 %v254_v48, %v234_v44  ;;  %v270_v5 = vadd.f32 %v255_v49, %v235_v40  ;;  %v271_v1 = vadd.f32 %v256_v46, %v236_v39  ;;  %v272_v4 = vadd.f32 %v257_v51, %v237_v38  ;;  %v3296_v44 = vld [vmem:[#allocation31_spill] sm:$0xff]  ;;  %v3298_v38 = vld [vmem:[#allocation32_spill] sm:$0xff]  ;;  %v3310_v47 = vld [vmem:[#allocation38_spill] sm:$0xff] }
  0x5d   :  { %v273_v10 = vadd.f32 %v258_v53, %v238_v37  ;;  %v274_v7 = vadd.f32 %v259_v54, %v239_v33  ;;  %v275_v6 = vadd.f32 %v260_v55, %v240_v32  ;;  %v276_v14 = vadd.f32 %v261_v56, %v241_v30  ;;  %v3300_v32 = vld [vmem:[#allocation33_spill] sm:$0xff]  ;;  %v3314_v49 = vld [vmem:[#allocation40_spill] sm:$0xff]  ;;  %v3320_v56 = vld [vmem:[#allocation43_spill] sm:$0xff] }
  0x5e   :  { %v277_v12 = vadd.f32 %v262_v58, %v242_v43  ;;  %v278_v3 = vadd.f32 %v263_v59, %v243_v31  ;;  %v279_v2 = vadd.f32 %v264_v61, %v244_v28  ;;  %v280_v19 = vadd.f32 %v265_v62, %v245_v17  ;;  %v3302_v31 = vld [vmem:[#allocation34_spill] sm:$0xff]  ;;  %v3308_v33 = vld [vmem:[#allocation37_spill] sm:$0xff]  ;;  %v3322_v59 = vld [vmem:[#allocation44_spill] sm:$0xff] }
  0x5f   :  { %v281_v25 = vadd.f32 %v266_v63, %v246_v29  ;;  %v282_v24 = vadd.f32 %v259_v54, %v247_v60  ;;  %v1899_v45 = vadd.f32 %v267_v8, %v1746_v13  ;;  %v1902_v23 = vadd.f32 %v268_v50, %v3294_v26  ;;  %v3304_v29 = vld [vmem:[#allocation35_spill] sm:$0xff]  ;;  %v3306_v13 = vld [vmem:[#allocation36_spill] sm:$0xff]  ;;  %v3316_v51 = vld [vmem:[#allocation41_spill] sm:$0xff] }
  0x60   :  { %v1905_v40 = vadd.f32 %v269_v18, %v3296_v44  ;;  %v1908_v37 = vadd.f32 %v270_v5, %v3298_v38  ;;  %v1911_v30 = vadd.f32 %v271_v1, %v3300_v32  ;;  %v1914_v28 = vadd.f32 %v272_v4, %v3302_v31  ;;  %v3318_v54 = vld [vmem:[#allocation42_spill] sm:$0xff]  ;;  %v3324_v61 = vld [vmem:[#allocation25_spill] sm:$0xff]  ;;  %v3325_v63 = vld [vmem:[#allocation20_spill] sm:$0xff] }
  0x61   :  { %3293 = vst [vmem:[#allocation22_spill] sm:$0xff] %v1899_v45  ;;  %3295 = vst [vmem:[#allocation29_spill] sm:$0xff] %v1902_v23  ;;  %v1917_v17 = vadd.f32 %v273_v10, %v3304_v29  ;;  %v1920_v43 = vadd.f32 %v274_v7, %v3306_v13  ;;  %v1923_v39 = vadd.f32 %v275_v6, %v3308_v33  ;;  %v303_v62 = vmul.f32 0.0, %v3324_v61  ;;  %v41_v7 = vld [vmem:[#allocation6 + $0x8] sm:$0xff]  ;;  %v3326_v6 = vld [vmem:[#allocation28_spill] sm:$0xff] }
  0x62   :  { %3297 = vst [vmem:[#allocation23_spill] sm:$0xff] %v1905_v40  ;;  %3299 = vst [vmem:[#allocation27_spill] sm:$0xff] %v1908_v37  ;;  %v1926_v57 = vadd.f32 %v276_v14, %v3310_v47  ;;  %v1929_v48 = vadd.f32 %v277_v12, %v3312_v11  ;;  %v1932_v46 = vadd.f32 %v278_v3, %v3314_v49  ;;  %v3327_v26 = vld [vmem:[#allocation26_spill] sm:$0xff]  ;;  %v3328_v11 = vld [vmem:[#allocation13_spill] sm:$0xff] }
  0x63   :  { %3301 = vst [vmem:[#allocation24_spill] sm:$0xff] %v1911_v30  ;;  %3303 = vst [vmem:[#allocation30_spill] sm:$0xff] %v1914_v28  ;;  %v1935_v53 = vadd.f32 %v279_v2, %v3316_v51  ;;  %v1938_v55 = vadd.f32 %v280_v19, %v3318_v54  ;;  %v1941_v58 = vadd.f32 %v281_v25, %v3320_v56 }
  0x64   :  { %3305 = vst [vmem:[#allocation31_spill] sm:$0xff] %v1917_v17  ;;  %3307 = vst [vmem:[#allocation32_spill] sm:$0xff] %v1920_v43  ;;  %v1944_v60 = vadd.f32 %v282_v24, %v3322_v59  ;;  %v304_v8 = vmul.f32 %v3324_v61, %v3325_v63  ;;  %v305_v50 = vmul.f32 %v3324_v61, %v1633_v15  ;;  %v3329_v43 = vld [vmem:[#allocation21_spill] sm:$0xff] }
  0x65   :  { %3309 = vst [vmem:[#allocation33_spill] sm:$0xff] %v1923_v39  ;;  %3311 = vst [vmem:[#allocation34_spill] sm:$0xff] %v1926_v57  ;;  %v306_v18 = vmul.f32 %v3324_v61, %v1635_v16  ;;  %v307_v5 = vmul.f32 %v3324_v61, %v1645_v20  ;;  %v308_v1 = vmul.f32 %v3324_v61, %v1647_v21  ;;  %vm51_vm1 = vcmp.lt.s32.totalorder %v3329_v43, 8 }
  0x66   :  { %3313 = vst [vmem:[#allocation35_spill] sm:$0xff] %v1929_v48  ;;  %3315 = vst [vmem:[#allocation36_spill] sm:$0xff] %v1932_v46  ;;  %v309_v4 = vmul.f32 %v3324_v61, %v1649_v22  ;;  %v310_v10 = vmul.f32 %v3324_v61, %v1664_v27  ;;  %v311_v14 = vmul.f32 %v3324_v61, %v3326_v6 }
  0x67   :  { %3317 = vst [vmem:[#allocation37_spill] sm:$0xff] %v1935_v53  ;;  %3319 = vst [vmem:[#allocation38_spill] sm:$0xff] %v1938_v55  ;;  %v312_v12 = vmul.f32 %v3324_v61, %v1673_v34  ;;  %v313_v3 = vmul.f32 %v3324_v61, %v1675_v35  ;;  %v314_v2 = vmul.f32 %v3324_v61, %v1677_v36 }
  0x68   :  { %3321 = vst [vmem:[#allocation39_spill] sm:$0xff] %v1941_v58  ;;  %3323 = vst [vmem:[#allocation40_spill] sm:$0xff] %v1944_v60  ;;  %v315_v19 = vmul.f32 %v3324_v61, %v1683_v41  ;;  %v316_v25 = vmul.f32 %v3324_v61, %v1685_v42  ;;  %v317_v24 = vmul.f32 %v3324_v61, %v3289_v0 }
  0x69   :  { %v322_v44 = vmul.f32 %v3327_v26, %v3325_v63  ;;  %v323_v38 = vmul.f32 %v3327_v26, %v1633_v15  ;;  %v324_v32 = vmul.f32 %v3327_v26, %v1635_v16  ;;  %v325_v31 = vmul.f32 %v3327_v26, %v1645_v20 }
  0x6a   :  { %v326_v29 = vmul.f32 %v3327_v26, %v1647_v21  ;;  %v327_v13 = vmul.f32 %v3327_v26, %v1649_v22  ;;  %v328_v33 = vmul.f32 %v3327_v26, %v1664_v27  ;;  %v329_v47 = vmul.f32 %v3327_v26, %v3291_v9 }
  0x6b   :  { %v357_v49 = vrot.slane %v41_v7, %v3328_v11  ;;  %v330_v51 = vmul.f32 %v3327_v26, %v3326_v6  ;;  %v331_v54 = vmul.f32 %v3327_v26, %v1673_v34  ;;  %v332_v56 = vmul.f32 %v3327_v26, %v1675_v35 }
  0x6c   :  { %v333_v59 = vmul.f32 %v3327_v26, %v1677_v36  ;;  %v334_v61 = vmul.f32 %v3327_v26, %v1683_v41  ;;  %v335_v63 = vmul.f32 %v3327_v26, %v1685_v42  ;;  %v336_v11 = vmul.f32 %v3327_v26, %v3289_v0 }
  0x6d   :  { %v337_v6 = vmul.f32 %v3327_v26, %v1697_v52  ;;  %v338_v60 = vadd.f32 %v322_v44, %v303_v62  ;;  %v339_v58 = vadd.f32 %v323_v38, %v304_v8  ;;  %v340_v55 = vadd.f32 %v324_v32, %v305_v50 }
  0x6e   :  { %v341_v53 = vadd.f32 %v325_v31, %v306_v18  ;;  %v342_v46 = vadd.f32 %v326_v29, %v307_v5  ;;  %v343_v48 = vadd.f32 %v327_v13, %v308_v1  ;;  %v344_v57 = vadd.f32 %v328_v33, %v309_v4 }
  0x6f   :  { %v358_v39 = vmul.f32 %v357_v49, %v1633_v15  ;;  %v345_v17 = vadd.f32 %v329_v47, %v310_v10  ;;  %v346_v28 = vadd.f32 %v330_v51, %v303_v62  ;;  %v347_v30 = vadd.f32 %v331_v54, %v311_v14  ;;  %v3331_v47 = vld [vmem:[#allocation22_spill] sm:$0xff] }
  0x70   :  { %v359_v37 = vmul.f32 %v357_v49, %v1635_v16  ;;  %v348_v40 = vadd.f32 %v332_v56, %v312_v12  ;;  %v349_v23 = vadd.f32 %v333_v59, %v313_v3  ;;  %v350_v45 = vadd.f32 %v334_v61, %v314_v2  ;;  %v3332_v56 = vld [vmem:[#allocation29_spill] sm:$0xff] }
  0x71   :  { %v360_v26 = vmul.f32 %v357_v49, %v1645_v20  ;;  %v351_v8 = vadd.f32 %v335_v63, %v315_v19  ;;  %v352_v50 = vadd.f32 %v336_v11, %v316_v25  ;;  %v353_v18 = vadd.f32 %v337_v6, %v317_v24 }
  0x72   :  { %v361_v5 = vmul.f32 %v357_v49, %v1647_v21  ;;  %v362_v1 = vmul.f32 %v357_v49, %v1649_v22  ;;  %v363_v15 = vmul.f32 %v357_v49, %v1664_v27  ;;  %v364_v4 = vmul.f32 %v357_v49, %v3291_v9  ;;  %v3330_v9 = vld [vmem:[#allocation15_spill] sm:$0xff] }
  0x73   :  { %v373_v62 = vadd.f32 %v358_v39, %v338_v60  ;;  %v365_v10 = vmul.f32 0.0, %v357_v49  ;;  %v366_v16 = vmul.f32 %v357_v49, %v1673_v34  ;;  %v367_v14 = vmul.f32 %v357_v49, %v1675_v35 }
  0x74   :  { %v374_v12 = vadd.f32 %v359_v37, %v339_v58  ;;  %v368_v20 = vmul.f32 %v357_v49, %v1677_v36  ;;  %v369_v3 = vmul.f32 %v357_v49, %v1683_v41  ;;  %v370_v2 = vmul.f32 %v357_v49, %v1685_v42 }
  0x75   :  { %v375_v21 = vadd.f32 %v360_v26, %v340_v55  ;;  %v371_v22 = vmul.f32 %v357_v49, %v3289_v0  ;;  %v372_v27 = vmul.f32 %v357_v49, %v1697_v52  ;;  %v376_v19 = vadd.f32 %v361_v5, %v341_v53  ;;  %v3333_v26 = vld [vmem:[#allocation23_spill] sm:$0xff] }
  0x76   :  { %v2024_v39 = vrot.slane %v41_v7, %v3330_v9  ;;  %v377_v60 = vadd.f32 %v362_v1, %v342_v46  ;;  %v378_v34 = vadd.f32 %v363_v15, %v343_v48  ;;  %v379_v25 = vadd.f32 %v364_v4, %v344_v57  ;;  %v3334_v1 = vld [vmem:[#allocation27_spill] sm:$0xff] }
  0x77   :  { %v389_v35 = vrot.slane %v373_v62, 1  ;;  %v380_v37 = vadd.f32 %v365_v10, %v345_v17  ;;  %v381_v58 = vadd.f32 %v366_v16, %v346_v28  ;;  %v382_v36 = vadd.f32 %v367_v14, %v347_v30  ;;  %v3335_v62 = vld [vmem:[#allocation24_spill] sm:$0xff]  ;;  %v3336_v16 = vld [vmem:[#allocation30_spill] sm:$0xff] }
  0x78   :  { %v390_v24 = vrot.slane %v374_v12, 1  ;;  %v383_v41 = vadd.f32 %v368_v20, %v348_v40  ;;  %v384_v44 = vadd.f32 %v369_v3, %v349_v23  ;;  %v385_v42 = vadd.f32 %v370_v2, %v350_v45  ;;  %v3338_v3 = vld [vmem:[#allocation31_spill] sm:$0xff] }
  0x79   :  { %v391_v55 = vrot.slane %v375_v21, 1  ;;  %v386_v38 = vadd.f32 %v371_v22, %v351_v8  ;;  %v387_v0 = vadd.f32 %v372_v27, %v352_v50  ;;  %v388_v32 = vadd.f32 %v365_v10, %v353_v18  ;;  %v3339_v21 = vld [vmem:[#allocation32_spill] sm:$0xff] }
  0x7a   :  { %v392_v52 = vrot.slane %v376_v19, 1  ;;  %v393_v53 = vrot.slane %v377_v60, 1  ;;  %v394_v31 = vrot.slane %v378_v34, 1  ;;  %v395_v7 = vrot.slane %v379_v25, 1  ;;  %v3341_v60 = vld [vmem:[#allocation33_spill] sm:$0xff]  ;;  %v3342_v25 = vld [vmem:[#allocation34_spill] sm:$0xff] }
  0x7b   :  { %v407_v48 = vsel %vm51_vm1, %v389_v35, 0.0  ;;  %v396_v57 = vrot.slane %v380_v37, 1  ;;  %v397_v46 = vrot.slane %v381_v58, 1  ;;  %v398_v17 = vrot.slane %v382_v36, 1  ;;  %v3344_v36 = vld [vmem:[#allocation35_spill] sm:$0xff] }
  0x7c   :  { %v408_v30 = vsel %vm51_vm1, %v390_v24, 0.0  ;;  %v399_v40 = vrot.slane %v383_v41, 1  ;;  %v400_v23 = vrot.slane %v384_v44, 1  ;;  %v401_v45 = vrot.slane %v385_v42, 1  ;;  %v3345_v41 = vld [vmem:[#allocation36_spill] sm:$0xff] }
  0x7d   :  { %v409_v28 = vsel %vm51_vm1, %v391_v55, 0.0  ;;  %v402_v29 = vrot.slane %v386_v38, 1  ;;  %v403_v13 = vrot.slane %v387_v0, 1  ;;  %v410_v33 = vsel %vm51_vm1, %v392_v52, 0.0  ;;  %v3347_v55 = vld [vmem:[#allocation37_spill] sm:$0xff] }
  0x7e   :  { %v423_v11 = vadd.f32 %v407_v48, %v3331_v47  ;;  %v404_v49 = vrot.slane %v388_v32, 1  ;;  %v411_v51 = vsel %vm51_vm1, %v393_v53, 0.0  ;;  %v412_v54 = vsel %vm51_vm1, %v394_v31, 0.0  ;;  %v3351_v53 = vld [vmem:[#allocation38_spill] sm:$0xff] }
  0x7f   :  { %v424_v59 = vadd.f32 %v408_v30, %v3332_v56  ;;  %v413_v61 = vsel %vm51_vm1, %v395_v7, 0.0  ;;  %v414_v63 = vsel %vm51_vm1, %v396_v57, 0.0  ;;  %v415_v6 = vsel %vm51_vm1, %v397_v46, 0.0  ;;  %v3355_v46 = vld [vmem:[#allocation39_spill] sm:$0xff] }
  0x80   :  { %v425_v8 = vadd.f32 %v409_v28, %v3333_v26  ;;  %v416_v50 = vsel %vm51_vm1, %v398_v17, 0.0  ;;  %v417_v18 = vsel %vm51_vm1, %v399_v40, 0.0  ;;  %v418_v5 = vsel %vm51_vm1, %v400_v23, 0.0 }
  0x81   :  { %v426_v15 = vadd.f32 %v410_v33, %v3334_v1  ;;  %v419_v4 = vsel %vm51_vm1, %v401_v45, 0.0  ;;  %v427_v10 = vadd.f32 %v411_v51, %v3335_v62  ;;  %v428_v14 = vadd.f32 %v412_v54, %v3336_v16  ;;  %v3359_v45 = vld [vmem:[#allocation40_spill] sm:$0xff] }
  0x82   :  { %v2059_v12 = vadd.f32 %v2024_v39, %v423_v11  ;;  %v420_v20 = vsel %vm51_vm1, %v402_v29, 0.0  ;;  %v429_v2 = vadd.f32 %v413_v61, %v3338_v3  ;;  %v430_v22 = vadd.f32 %v414_v63, %v3339_v21 }
  0x83   :  { %v2066_v27 = vadd.f32 %v2024_v39, %v424_v59  ;;  %v421_v19 = vsel %vm51_vm1, %v403_v13, 0.0  ;;  %v431_v34 = vadd.f32 %v415_v6, %v3341_v60  ;;  %v432_v35 = vadd.f32 %v416_v50, %v3342_v25 }
  0x84   :  { %3337 = vst [vmem:[#allocation41_spill] sm:$0xff] %v2059_v12  ;;  %v2073_v37 = vadd.f32 %v2024_v39, %v425_v8  ;;  %v422_v58 = vsel %vm51_vm1, %v404_v49, 0.0  ;;  %v433_v24 = vadd.f32 %v417_v18, %v3344_v36  ;;  %v434_v44 = vadd.f32 %v418_v5, %v3345_v41 }
  0x85   :  { %3340 = vst [vmem:[#allocation42_spill] sm:$0xff] %v2066_v27  ;;  %v2080_v42 = vadd.f32 %v2024_v39, %v426_v15  ;;  %v435_v38 = vadd.f32 %v419_v4, %v3347_v55  ;;  %v2084_v0 = vadd.f32 %v2024_v39, %v427_v10  ;;  %v2087_v32 = vadd.f32 %v2024_v39, %v428_v14 }
  0x86   :  { %3343 = vst [vmem:[#allocation43_spill] sm:$0xff] %v2073_v37  ;;  %v2090_v52 = vmul.f32 0.70710677, %v2059_v12  ;;  %v436_v31 = vadd.f32 %v420_v20, %v3351_v53  ;;  %v2094_v7 = vadd.f32 %v2024_v39, %v429_v2  ;;  %v2097_v48 = vadd.f32 %v2024_v39, %v430_v22 }
  0x87   :  { %3346 = vst [vmem:[#allocation44_spill] sm:$0xff] %v2080_v42  ;;  %3348 = vst [vmem:[#allocation25_spill] sm:$0xff] %v2084_v0  ;;  %v2100_v57 = vmul.f32 0.70710677, %v2066_v27  ;;  %v437_v17 = vadd.f32 %v421_v19, %v3355_v46  ;;  %v2104_v30 = vadd.f32 %v2024_v39, %v431_v34  ;;  %v2107_v40 = vadd.f32 %v2024_v39, %v432_v35 }
  0x88   :  { %3349 = vst [vmem:[#allocation20_spill] sm:$0xff] %v2087_v32  ;;  %3350 = vst [vmem:[#allocation28_spill] sm:$0xff] %v2090_v52  ;;  %v2110_v23 = vmul.f32 0.70710677, %v2073_v37  ;;  %v438_v28 = vadd.f32 %v422_v58, %v3359_v45  ;;  %v2114_v29 = vadd.f32 %v2024_v39, %v433_v24  ;;  %v2117_v13 = vadd.f32 %v2024_v39, %v434_v44 }
  0x89   :  { %3352 = vst [vmem:[#allocation26_spill] sm:$0xff] %v2094_v7  ;;  %3353 = vst [vmem:[#allocation22_spill] sm:$0xff] %v2097_v48  ;;  %v2120_v33 = vmul.f32 0.70710677, %v2080_v42  ;;  %v2123_v47 = vadd.f32 %v2024_v39, %v435_v38  ;;  %v2126_v11 = vmul.f32 0.70710677, %v2084_v0  ;;  %v2135_v54 = vadd.f32 %v2024_v39, %v436_v31 }
  0x8a   :  { %3354 = vst [vmem:[#allocation29_spill] sm:$0xff] %v2100_v57  ;;  %3356 = vst [vmem:[#allocation23_spill] sm:$0xff] %v2104_v30  ;;  %v2129_v49 = vmul.f32 0.70710677, %v2087_v32  ;;  %v2132_v51 = vand.u32 2147483647, %v2090_v52  ;;  %v2147_v63 = vadd.f32 %v2024_v39, %v437_v17  ;;  %v2159_v50 = vadd.f32 %v2024_v39, %v438_v28 }
  0x8b   :  { %3357 = vst [vmem:[#allocation27_spill] sm:$0xff] %v2107_v40  ;;  %3358 = vst [vmem:[#allocation24_spill] sm:$0xff] %v2110_v23  ;;  %v2138_v56 = vmul.f32 0.70710677, %v2094_v7  ;;  %v2141_v59 = vmul.f32 0.70710677, %v2097_v48 }
  0x8c   :  { %3360 = vst [vmem:[#allocation30_spill] sm:$0xff] %v2114_v29  ;;  %3361 = vst [vmem:[#allocation31_spill] sm:$0xff] %v2117_v13  ;;  %v2144_v61 = vand.u32 2147483647, %v2100_v57  ;;  %v2150_v6 = vmul.f32 0.70710677, %v2104_v30 }
  0x8d   :  { %3362 = vst [vmem:[#allocation32_spill] sm:$0xff] %v2120_v33  ;;  %3363 = vst [vmem:[#allocation33_spill] sm:$0xff] %v2123_v47  ;;  %v2153_v26 = vmul.f32 0.70710677, %v2107_v40  ;;  %v2156_v8 = vand.u32 2147483647, %v2110_v23 }
  0x8e   :  { %3364 = vst [vmem:[#allocation34_spill] sm:$0xff] %v2126_v11  ;;  %3365 = vst [vmem:[#allocation35_spill] sm:$0xff] %v2129_v49  ;;  %v2162_v18 = vmul.f32 0.70710677, %v2114_v29  ;;  %v2165_v5 = vmul.f32 0.70710677, %v2117_v13 }
  0x8f   :  { %3366 = vst [vmem:[#allocation36_spill] sm:$0xff] %v2135_v54  ;;  %3367 = vst [vmem:[#allocation37_spill] sm:$0xff] %v2138_v56  ;;  %v2168_v1 = vand.u32 2147483647, %v2120_v33  ;;  %v2171_v15 = vmul.f32 0.70710677, %v2123_v47 }
  0x90   :  { %3368 = vst [vmem:[#allocation38_spill] sm:$0xff] %v2141_v59  ;;  %3369 = vst [vmem:[#allocation39_spill] sm:$0xff] %v2147_v63  ;;  %v2174_v4 = vand.u32 2147483647, %v2126_v11  ;;  %v491_v62 = vmul.f32 0.3275911, %v2132_v51 }
  0x91   :  { %3370 = vst [vmem:[#allocation40_spill] sm:$0xff] %v2150_v6  ;;  %3371 = vst [vmem:[#allocation45_spill] sm:$0xff] %v2153_v26  ;;  %v2178_v39 = vmul.f32 0.70710677, %v2135_v54  ;;  %v2181_v10 = vand.u32 2147483647, %v2129_v49 }
  0x92   :  { %3372 = vst [vmem:[#allocation46_spill] sm:$0xff] %v2159_v50  ;;  %3373 = vst [vmem:[#allocation47_spill] sm:$0xff] %v2162_v18  ;;  %v492_v16 = vmul.f32 0.3275911, %v2144_v61  ;;  %v2185_v14 = vmul.f32 0.70710677, %v2147_v63 }
  0x93   :  { %3374 = vst [vmem:[#allocation48_spill] sm:$0xff] %v2165_v5  ;;  %3375 = vst [vmem:[#allocation49_spill] sm:$0xff] %v2171_v15  ;;  %v2188_v20 = vand.u32 2147483647, %v2138_v56  ;;  %v493_v3 = vmul.f32 0.3275911, %v2156_v8 }
  0x94   :  { %3376 = vst [vmem:[#allocation50_spill] sm:$0xff] %v2178_v39  ;;  %3377 = vst [vmem:[#allocation51_spill] sm:$0xff] %v2185_v14  ;;  %v2192_v2 = vmul.f32 0.70710677, %v2159_v50  ;;  %v2195_v21 = vand.u32 2147483647, %v2141_v59 }
  0x95   :  { %v494_v22 = vmul.f32 0.3275911, %v2168_v1  ;;  %v2199_v19 = vand.u32 2147483647, %v2150_v6  ;;  %v495_v60 = vmul.f32 0.3275911, %v2174_v4 }
  0x96   :  { %3378 = vst [vmem:[#allocation52_spill] sm:$0xff] %v2192_v2  ;;  %v507_v34 = vadd.f32 1.0, %v491_v62  ;;  %v2203_v25 = vand.u32 2147483647, %v2153_v26  ;;  %v496_v35 = vmul.f32 0.3275911, %v2181_v10 }
  0x97   :  { %v508_v58 = vadd.f32 1.0, %v492_v16  ;;  %v2207_v36 = vand.u32 2147483647, %v2162_v18  ;;  %v497_v24 = vmul.f32 0.3275911, %v2188_v20  ;;  %v509_v41 = vadd.f32 1.0, %v493_v3 }
  0x98   :  { %v2211_v44 = vand.u32 2147483647, %v2165_v5  ;;  %v498_v55 = vmul.f32 0.3275911, %v2195_v21  ;;  %v510_v38 = vadd.f32 1.0, %v494_v22  ;;  %v511_v46 = vadd.f32 1.0, %v495_v60 }
  0x99   :  { %v2215_v53 = vand.u32 2147483647, %v2171_v15  ;;  %v499_v31 = vmul.f32 0.3275911, %v2199_v19  ;;  %1413 = vrcp.f32 %v507_v34  ;;  %v2219_v17 = vand.u32 2147483647, %v2178_v39 }
  0x9a   :  { %v500_v45 = vmul.f32 0.3275911, %v2203_v25  ;;  %v512_v28 = vadd.f32 1.0, %v496_v35  ;;  %1415 = vrcp.f32 %v508_v58  ;;  %v2223_v62 = vand.u32 2147483647, %v2185_v14 }
  0x9b   :  { %v501_v16 = vmul.f32 0.3275911, %v2207_v36  ;;  %v513_v3 = vadd.f32 1.0, %v497_v24  ;;  %1417 = vrcp.f32 %v509_v41  ;;  %v2227_v22 = vand.u32 2147483647, %v2192_v2 }
  0x9c   :  { %v502_v60 = vmul.f32 0.3275911, %v2211_v44  ;;  %v514_v34 = vadd.f32 1.0, %v498_v55  ;;  %1419 = vrcp.f32 %v510_v38  ;;  %v503_v43 = vmul.f32 0.3275911, %v2215_v53 }
  0x9d   :  { %v515_v9 = vadd.f32 1.0, %v499_v31  ;;  %1421 = vrcp.f32 %v511_v46  ;;  %v504_v35 = vmul.f32 0.3275911, %v2219_v17  ;;  %v516_v58 = vadd.f32 1.0, %v500_v45 }
  0x9e   :  { %1423 = vrcp.f32 %v512_v28  ;;  %v505_v50 = vmul.f32 0.3275911, %v2223_v62  ;;  %v517_v63 = vadd.f32 1.0, %v501_v16  ;;  %v506_v24 = vmul.f32 0.3275911, %v2227_v22 }
  0x9f   :  { %1425 = vrcp.f32 %v513_v3  ;;  %v518_v41 = vadd.f32 1.0, %v502_v60  ;;  %v519_v2 = vadd.f32 1.0, %v503_v43  ;;  %v520_v55 = vadd.f32 1.0, %v504_v35 }
  0xa0   :  { %1427 = vrcp.f32 %v514_v34  ;;  %v521_v31 = vadd.f32 1.0, %v505_v50  ;;  %v522_v45 = vadd.f32 1.0, %v506_v24  ;;  %v683_v3 = vsub.f32 0.0, %v2132_v51 }
  0xa1   :  { %1429 = vrcp.f32 %v515_v9  ;;  %v684_v9 = vsub.f32 0.0, %v2144_v61  ;;  %v685_v50 = vsub.f32 0.0, %v2156_v8  ;;  %v687_v34 = vsub.f32 0.0, %v2174_v4 }
  0xa2   :  { %1431 = vrcp.f32 %v516_v58  ;;  %v689_v35 = vsub.f32 0.0, %v2188_v20  ;;  %v690_v24 = vsub.f32 0.0, %v2195_v21  ;;  %v695_v14 = vsub.f32 0.0, %v2215_v53 }
  0xa3   :  { %v2234_v38 = vpop.eup %1413  ;;  %1433 = vrcp.f32 %v517_v63  ;;  %v686_v63 = vsub.f32 0.0, %v2168_v1  ;;  %v696_v47 = vsub.f32 0.0, %v2219_v17  ;;  %v699_v39 = vmul.f32 %v683_v3, %v2132_v51 }
  0xa4   :  { %v2236_v46 = vpop.eup %1415  ;;  %1435 = vrcp.f32 %v518_v41  ;;  %v691_v41 = vsub.f32 0.0, %v2199_v19  ;;  %v539_v29 = vmul.f32 1.0614054, %v2234_v38  ;;  %v697_v40 = vsub.f32 0.0, %v2223_v62 }
  0xa5   :  { %v2238_v28 = vpop.eup %1417  ;;  %1437 = vrcp.f32 %v519_v2  ;;  %v688_v2 = vsub.f32 0.0, %v2181_v10  ;;  %v700_v30 = vmul.f32 %v684_v9, %v2144_v61  ;;  %v701_v48 = vmul.f32 %v685_v50, %v2156_v8 }
  0xa6   :  { %v2240_v16 = vpop.eup %1419  ;;  %1439 = vrcp.f32 %v520_v55  ;;  %v692_v55 = vsub.f32 0.0, %v2203_v25  ;;  %v540_v7 = vmul.f32 1.0614054, %v2236_v46  ;;  %v698_v5 = vsub.f32 0.0, %v2227_v22 }
  0xa7   :  { %v2243_v43 = vpop.eup %1421  ;;  %1441 = vrcp.f32 %v521_v31  ;;  %v693_v31 = vsub.f32 0.0, %v2207_v36  ;;  %v702_v32 = vmul.f32 %v686_v63, %v2168_v1  ;;  %v703_v51 = vmul.f32 %v687_v34, %v2174_v4 }
  0xa8   :  { %v2248_v60 = vpop.eup %1423  ;;  %1443 = vrcp.f32 %v522_v45  ;;  %v694_v45 = vsub.f32 0.0, %v2211_v44  ;;  %v541_v18 = vmul.f32 1.0614054, %v2238_v28  ;;  %v2281_v0 = vmul.f32 %v688_v2, %v2181_v10 }
  0xa9   :  { %v2253_v58 = vpop.eup %1425  ;;  %v2284_v61 = vmul.f32 %v689_v35, %v2188_v20  ;;  %v2287_v8 = vmul.f32 %v690_v24, %v2195_v21  ;;  %v542_v50 = vmul.f32 1.0614054, %v2240_v16  ;;  %v2293_v1 = vmul.f32 %v691_v41, %v2199_v19 }
  0xaa   :  { %v2259_v54 = vpop.eup %1427  ;;  %v2296_v4 = vmul.f32 %v692_v55, %v2203_v25  ;;  %v715_v63 = vmul.f32 1.442695, %v699_v39  ;;  %v555_v10 = vadd.f32 -1.4531521, %v539_v29  ;;  %v2301_v20 = vmul.f32 %v693_v31, %v2207_v36 }
  0xab   :  { %v2265_v13 = vpop.eup %1429  ;;  %v2303_v2 = vmul.f32 1.442695, %v700_v30  ;;  %v2305_v21 = vmul.f32 1.442695, %v701_v48  ;;  %v556_v24 = vadd.f32 -1.4531521, %v540_v7  ;;  %v2310_v19 = vmul.f32 %v694_v45, %v2211_v44 }
  0xac   :  { %v2271_v15 = vpop.eup %1431  ;;  %v2312_v41 = vmul.f32 1.442695, %v702_v32  ;;  %v2314_v25 = vmul.f32 1.442695, %v703_v51  ;;  %v543_v29 = vmul.f32 1.0614054, %v2243_v43  ;;  %v2321_v48 = vmul.f32 %v695_v14, %v2215_v53 }
  0xad   :  { %v2277_v3 = vpop.eup %1433  ;;  %v544_v36 = vmul.f32 1.0614054, %v2248_v60  ;;  %v557_v30 = vadd.f32 -1.4531521, %v541_v18  ;;  %v545_v7 = vmul.f32 1.0614054, %v2253_v58  ;;  %v2328_v31 = vmul.f32 %v696_v47, %v2219_v17 }
  0xae   :  { %v2289_v9 = vpop.eup %1435  ;;  %v546_v44 = vmul.f32 1.0614054, %v2259_v54  ;;  %v558_v32 = vadd.f32 -1.4531521, %v542_v50  ;;  %v547_v45 = vmul.f32 1.0614054, %v2265_v13  ;;  %v2334_v18 = vmul.f32 %v697_v40, %v2223_v62 }
  0xaf   :  { %v2298_v34 = vpop.eup %1437  ;;  %v548_v51 = vmul.f32 1.0614054, %v2271_v15  ;;  %v549_v26 = vmul.f32 1.0614054, %v2277_v3  ;;  %v550_v14 = vmul.f32 1.0614054, %v2289_v9  ;;  %v2340_v50 = vmul.f32 %v698_v5, %v2227_v22 }
  0xb0   :  { %v2307_v35 = vpop.eup %1439  ;;  %v551_v53 = vmul.f32 1.0614054, %v2298_v34  ;;  %v559_v42 = vadd.f32 -1.4531521, %v543_v29  ;;  %v571_v59 = vmul.f32 %v2234_v38, %v555_v10  ;;  %v560_v37 = vadd.f32 -1.4531521, %v544_v36 }
  0xb1   :  { %v2316_v39 = vpop.eup %1441  ;;  %v552_v6 = vmul.f32 1.0614054, %v2307_v35  ;;  %3379 = vst [vmem:[#allocation53_spill] sm:$0xff] %v2340_v50  ;;  %v561_v56 = vadd.f32 -1.4531521, %v545_v7  ;;  %v572_v62 = vmul.f32 %v2236_v46, %v556_v24  ;;  %1445 = vpow2.f32 %v715_v63 }
  0xb2   :  { %v2323_v55 = vpop.eup %1443  ;;  %v553_v47 = vmul.f32 1.0614054, %v2316_v39  ;;  %v562_v40 = vadd.f32 -1.4531521, %v546_v44  ;;  %v563_v49 = vadd.f32 -1.4531521, %v547_v45  ;;  %v573_v22 = vmul.f32 %v2238_v28, %v557_v30 }
  0xb3   :  { %v554_v17 = vmul.f32 1.0614054, %v2323_v55  ;;  %v564_v11 = vadd.f32 -1.4531521, %v548_v51  ;;  %v565_v27 = vadd.f32 -1.4531521, %v549_v26  ;;  %v574_v29 = vmul.f32 %v2240_v16, %v558_v32 }
  0xb4   :  { %v566_v12 = vadd.f32 -1.4531521, %v550_v14  ;;  %v567_v33 = vadd.f32 -1.4531521, %v551_v53  ;;  %v568_v5 = vadd.f32 -1.4531521, %v552_v6  ;;  %v575_v10 = vmul.f32 %v2243_v43, %v559_v42 }
  0xb5   :  { %v569_v23 = vadd.f32 -1.4531521, %v553_v47  ;;  %v570_v57 = vadd.f32 -1.4531521, %v554_v17  ;;  %v576_v36 = vmul.f32 %v2248_v60, %v560_v37  ;;  %v577_v7 = vmul.f32 %v2253_v58, %v561_v56 }
  0xb6   :  { %v578_v24 = vmul.f32 %v2259_v54, %v562_v40  ;;  %v587_v44 = vadd.f32 1.4214138, %v571_v59  ;;  %v579_v26 = vmul.f32 %v2265_v13, %v563_v49  ;;  %v580_v63 = vmul.f32 %v2271_v15, %v564_v11 }
  0xb7   :  { %v581_v6 = vmul.f32 %v2277_v3, %v565_v27  ;;  %v588_v30 = vadd.f32 1.4214138, %v572_v62  ;;  %v582_v45 = vmul.f32 %v2289_v9, %v566_v12  ;;  %v583_v32 = vmul.f32 %v2298_v34, %v567_v33 }
  0xb8   :  { %v584_v42 = vmul.f32 %v2307_v35, %v568_v5  ;;  %v589_v51 = vadd.f32 1.4214138, %v573_v22  ;;  %v585_v37 = vmul.f32 %v2316_v39, %v569_v23  ;;  %v586_v56 = vmul.f32 %v2323_v55, %v570_v57 }
  0xb9   :  { %v590_v14 = vadd.f32 1.4214138, %v574_v29  ;;  %v591_v59 = vadd.f32 1.4214138, %v575_v10  ;;  %v592_v53 = vadd.f32 1.4214138, %v576_v36  ;;  %v603_v11 = vmul.f32 %v2234_v38, %v587_v44 }
  0xba   :  { %v593_v49 = vadd.f32 1.4214138, %v577_v7  ;;  %v594_v47 = vadd.f32 1.4214138, %v578_v24  ;;  %v595_v27 = vadd.f32 1.4214138, %v579_v26  ;;  %v604_v12 = vmul.f32 %v2236_v46, %v588_v30 }
  0xbb   :  { %v596_v17 = vadd.f32 1.4214138, %v580_v63  ;;  %v597_v40 = vadd.f32 1.4214138, %v581_v6  ;;  %v598_v33 = vadd.f32 1.4214138, %v582_v45  ;;  %v605_v22 = vmul.f32 %v2238_v28, %v589_v51  ;;  %v2363_v23 = vpop.eup %1445 }
  0xbc   :  { %v599_v62 = vadd.f32 1.4214138, %v583_v32  ;;  %v600_v5 = vadd.f32 1.4214138, %v584_v42  ;;  %v601_v57 = vadd.f32 1.4214138, %v585_v37  ;;  %v606_v10 = vmul.f32 %v2240_v16, %v590_v14 }
  0xbd   :  { %v602_v29 = vadd.f32 1.4214138, %v586_v56  ;;  %v607_v36 = vmul.f32 %v2243_v43, %v591_v59  ;;  %v608_v7 = vmul.f32 %v2248_v60, %v592_v53  ;;  %v609_v24 = vmul.f32 %v2253_v58, %v593_v49 }
  0xbe   :  { %v610_v44 = vmul.f32 %v2259_v54, %v594_v47  ;;  %v619_v26 = vadd.f32 -0.28449672, %v603_v11  ;;  %v611_v63 = vmul.f32 %v2265_v13, %v595_v27  ;;  %v612_v6 = vmul.f32 %v2271_v15, %v596_v17 }
  0xbf   :  { %v613_v30 = vmul.f32 %v2277_v3, %v597_v40  ;;  %v620_v45 = vadd.f32 -0.28449672, %v604_v12  ;;  %v614_v32 = vmul.f32 %v2289_v9, %v598_v33  ;;  %v615_v42 = vmul.f32 %v2298_v34, %v599_v62 }
  0xc0   :  { %v616_v51 = vmul.f32 %v2307_v35, %v600_v5  ;;  %v621_v37 = vadd.f32 -0.28449672, %v605_v22  ;;  %v617_v56 = vmul.f32 %v2316_v39, %v601_v57  ;;  %v618_v14 = vmul.f32 %v2323_v55, %v602_v29 }
  0xc1   :  { %v622_v59 = vadd.f32 -0.28449672, %v606_v10  ;;  %v623_v53 = vadd.f32 -0.28449672, %v607_v36  ;;  %v624_v49 = vadd.f32 -0.28449672, %v608_v7  ;;  %v635_v27 = vmul.f32 %v2234_v38, %v619_v26 }
  0xc2   :  { %v625_v47 = vadd.f32 -0.28449672, %v609_v24  ;;  %v626_v11 = vadd.f32 -0.28449672, %v610_v44  ;;  %v627_v17 = vadd.f32 -0.28449672, %v611_v63  ;;  %v636_v33 = vmul.f32 %v2236_v46, %v620_v45 }
  0xc3   :  { %v628_v40 = vadd.f32 -0.28449672, %v612_v6  ;;  %v629_v12 = vadd.f32 -0.28449672, %v613_v30  ;;  %v630_v62 = vadd.f32 -0.28449672, %v614_v32  ;;  %v637_v22 = vmul.f32 %v2238_v28, %v621_v37 }
  0xc4   :  { %v631_v52 = vadd.f32 -0.28449672, %v615_v42  ;;  %v632_v5 = vadd.f32 -0.28449672, %v616_v51  ;;  %v633_v57 = vadd.f32 -0.28449672, %v617_v56  ;;  %v638_v29 = vmul.f32 %v2240_v16, %v622_v59 }
  0xc5   :  { %v634_v50 = vadd.f32 -0.28449672, %v618_v14  ;;  %1447 = vpow2.f32 %v2303_v2  ;;  %v639_v10 = vmul.f32 %v2243_v43, %v623_v53  ;;  %v640_v36 = vmul.f32 %v2248_v60, %v624_v49 }
  0xc6   :  { %v641_v7 = vmul.f32 %v2253_v58, %v625_v47  ;;  %v642_v24 = vmul.f32 %v2259_v54, %v626_v11  ;;  %v643_v44 = vmul.f32 %v2265_v13, %v627_v17  ;;  %v644_v26 = vmul.f32 %v2271_v15, %v628_v40 }
  0xc7   :  { %v645_v63 = vmul.f32 %v2277_v3, %v629_v12  ;;  %1449 = vpow2.f32 %v2305_v21  ;;  %v646_v6 = vmul.f32 %v2289_v9, %v630_v62  ;;  %v647_v2 = vmul.f32 %v2298_v34, %v631_v52 }
  0xc8   :  { %v648_v30 = vmul.f32 %v2307_v35, %v632_v5  ;;  %v651_v45 = vadd.f32 0.2548296, %v635_v27  ;;  %v649_v32 = vmul.f32 %v2316_v39, %v633_v57  ;;  %v652_v42 = vadd.f32 0.2548296, %v636_v33 }
  0xc9   :  { %1451 = vpow2.f32 %v2312_v41  ;;  %v725_v51 = vmul.f32 1.442695, %v2281_v0  ;;  %v650_v37 = vmul.f32 %v2323_v55, %v634_v50  ;;  %v653_v56 = vadd.f32 0.2548296, %v637_v22 }
  0xca   :  { %v654_v14 = vadd.f32 0.2548296, %v638_v29  ;;  %v655_v59 = vadd.f32 0.2548296, %v639_v10  ;;  %v656_v21 = vadd.f32 0.2548296, %v640_v36  ;;  %1453 = vpow2.f32 %v2314_v25 }
  0xcb   :  { %v657_v53 = vadd.f32 0.2548296, %v641_v7  ;;  %v727_v52 = vmul.f32 1.442695, %v2284_v61  ;;  %v658_v49 = vadd.f32 0.2548296, %v642_v24  ;;  %v667_v27 = vmul.f32 %v2234_v38, %v651_v45 }
  0xcc   :  { %v659_v47 = vadd.f32 0.2548296, %v643_v44  ;;  %v660_v11 = vadd.f32 0.2548296, %v644_v26  ;;  %v661_v17 = vadd.f32 0.2548296, %v645_v63  ;;  %1455 = vpow2.f32 %v725_v51 }
  0xcd   :  { %v662_v41 = vadd.f32 0.2548296, %v646_v6  ;;  %v729_v0 = vmul.f32 1.442695, %v2287_v8  ;;  %v663_v50 = vadd.f32 0.2548296, %v647_v2  ;;  %v668_v33 = vmul.f32 %v2236_v46, %v652_v42 }
  0xce   :  { %v664_v40 = vadd.f32 0.2548296, %v648_v30  ;;  %v665_v12 = vadd.f32 0.2548296, %v649_v32  ;;  %v666_v5 = vadd.f32 0.2548296, %v650_v37  ;;  %v669_v25 = vmul.f32 %v2238_v28, %v653_v56 }
  0xcf   :  { %v1448_v62 = vpop.eup %1447  ;;  %1457 = vpow2.f32 %v727_v52  ;;  %v731_v61 = vmul.f32 1.442695, %v2293_v1  ;;  %v670_v22 = vmul.f32 %v2240_v16, %v654_v14  ;;  %v671_v38 = vmul.f32 %v2243_v43, %v655_v59  ;;  %v3381_v2 = vld [vmem:[#allocation28_spill] sm:$0xff]  ;;  %v3386_v42 = vld [vmem:[#allocation42_spill] sm:$0xff]  ;;  %v3388_v52 = vld [vmem:[#allocation35_spill] sm:$0xff] }
  0xd0   :  { %v672_v57 = vmul.f32 %v2248_v60, %v656_v21  ;;  %v733_v8 = vmul.f32 1.442695, %v2296_v4  ;;  %v673_v10 = vmul.f32 %v2253_v58, %v657_v53  ;;  %v674_v46 = vmul.f32 %v2259_v54, %v658_v49  ;;  %v3383_v30 = vld [vmem:[#allocation24_spill] sm:$0xff]  ;;  %v3387_v53 = vld [vmem:[#allocation34_spill] sm:$0xff]  ;;  %v3389_v49 = vld [vmem:[#allocation37_spill] sm:$0xff] }
  0xd1   :  { %v1450_v29 = vpop.eup %1449  ;;  %v2412_v36 = vmul.f32 %v2265_v13, %v659_v47  ;;  %1459 = vpow2.f32 %v729_v0  ;;  %v2415_v28 = vmul.f32 %v2271_v15, %v660_v11  ;;  %v2418_v16 = vmul.f32 %v2277_v3, %v661_v17  ;;  %v3390_v47 = vld [vmem:[#allocation43_spill] sm:$0xff] }
  0xd2   :  { %v747_v43 = vmul.f32 %v2363_v23, %v667_v27  ;;  %v748_v60 = vmul.f32 %v1448_v62, %v668_v33  ;;  %v2422_v4 = vmul.f32 %v2289_v9, %v662_v41  ;;  %v2425_v58 = vmul.f32 %v2298_v34, %v663_v50  ;;  %v3391_v50 = vld [vmem:[#allocation38_spill] sm:$0xff] }
  0xd3   :  { %v1452_v1 = vpop.eup %1451  ;;  %1461 = vpow2.f32 %v731_v61  ;;  %v735_v13 = vmul.f32 1.442695, %v2301_v20  ;;  %v2429_v54 = vmul.f32 %v2307_v35, %v664_v40  ;;  %v737_v15 = vmul.f32 1.442695, %v2310_v19  ;;  %v3380_v19 = vld [vmem:[#allocation53_spill] sm:$0xff]  ;;  %v3392_v40 = vld [vmem:[#allocation44_spill] sm:$0xff] }
  0xd4   :  { %1463 = vpow2.f32 %v733_v8  ;;  %v749_v3 = vmul.f32 %v1450_v29, %v669_v25  ;;  %v1454_v7 = vpop.eup %1453  ;;  %v2433_v23 = vmul.f32 %v2316_v39, %v665_v12  ;;  %v2436_v9 = vmul.f32 %v2323_v55, %v666_v5  ;;  %v3382_v39 = vld [vmem:[#allocation29_spill] sm:$0xff] }
  0xd5   :  { %v739_v34 = vmul.f32 1.442695, %v2321_v48  ;;  %v741_v24 = vmul.f32 1.442695, %v2328_v31  ;;  %v743_v20 = vmul.f32 1.442695, %v2334_v18  ;;  %v750_v44 = vmul.f32 %v1452_v1, %v670_v22 }
  0xd6   :  { %v779_v35 = vsub.f32 2.0, %v747_v43  ;;  %v780_v26 = vsub.f32 2.0, %v748_v60  ;;  %v1456_v63 = vpop.eup %1455  ;;  %1465 = vpow2.f32 %v735_v13  ;;  %v745_v6 = vmul.f32 1.442695, %v3380_v19  ;;  %v3384_v31 = vld [vmem:[#allocation32_spill] sm:$0xff]  ;;  %v3385_v18 = vld [vmem:[#allocation41_spill] sm:$0xff] }
  0xd7   :  { %vm763_vm2 = vcmp.ge.f32.partialorder %v3381_v2, 0.0  ;;  %vm764_vm3 = vcmp.ge.f32.partialorder %v3382_v39, 0.0  ;;  %1467 = vpow2.f32 %v737_v15  ;;  %v751_v55 = vmul.f32 %v1454_v7, %v671_v38  ;;  %v3393_v38 = vld [vmem:[#allocation40_spill] sm:$0xff]  ;;  %v3395_v8 = vld [vmem:[#allocation25_spill] sm:$0xff]  ;;  %v3396_v15 = vld [vmem:[#allocation47_spill] sm:$0xff] }
  0xd8   :  { %vm765_vm4 = vcmp.ge.f32.partialorder %v3383_v30, 0.0  ;;  %v781_v48 = vsub.f32 2.0, %v749_v3  ;;  %1469 = vpow2.f32 %v739_v34  ;;  %vm766_vm5 = vcmp.ge.f32.partialorder %v3384_v31, 0.0  ;;  %v3399_v19 = vld [vmem:[#allocation26_spill] sm:$0xff] }
  0xd9   :  { %v1458_v45 = vpop.eup %1457  ;;  %v811_v32 = vmul.f32 0.5, %v3385_v18  ;;  %v812_v51 = vmul.f32 0.5, %v3386_v42  ;;  %v752_v37 = vmul.f32 %v1456_v63, %v672_v57  ;;  %v782_v56 = vsub.f32 2.0, %v750_v44  ;;  %v3394_v57 = vld [vmem:[#allocation45_spill] sm:$0xff]  ;;  %v3398_v63 = vld [vmem:[#allocation48_spill] sm:$0xff] }
  0xda   :  { %v795_v14 = vsel %vm763_vm2, %v779_v35, %v747_v43  ;;  %v796_v59 = vsel %vm764_vm3, %v780_v26, %v748_v60  ;;  %vm767_vm6 = vcmp.ge.f32.partialorder %v3387_v53, 0.0  ;;  %vm768_vm7 = vcmp.ge.f32.partialorder %v3388_v52, 0.0  ;;  %v3400_v18 = vld [vmem:[#allocation49_spill] sm:$0xff] }
  0xdb   :  { %v1460_v21 = vpop.eup %1459  ;;  %vm769_vm8 = vcmp.ge.f32.partialorder %v3389_v49, 0.0  ;;  %v813_v11 = vmul.f32 0.5, %v3390_v47  ;;  %1471 = vpow2.f32 %v741_v24  ;;  %v753_v27 = vmul.f32 %v1458_v45, %v673_v10 }
  0xdc   :  { %v783_v17 = vsub.f32 2.0, %v751_v55  ;;  %v797_v41 = vsel %vm765_vm4, %v781_v48, %v749_v3  ;;  %vm770_vm9 = vcmp.ge.f32.partialorder %v3391_v50, 0.0  ;;  %v814_v12 = vmul.f32 0.5, %v3392_v40  ;;  %v3397_v3 = vld [vmem:[#allocation20_spill] sm:$0xff]  ;;  %v3403_v40 = vld [vmem:[#allocation27_spill] sm:$0xff] }
  0xdd   :  { %v1462_v0 = vpop.eup %1461  ;;  %v2456_v33 = vmul.f32 %v811_v32, %v795_v14  ;;  %v2458_v62 = vmul.f32 %v812_v51, %v796_v59  ;;  %1473 = vpow2.f32 %v743_v20  ;;  %v754_v25 = vmul.f32 %v1460_v21, %v674_v46  ;;  %v3401_v32 = vld [vmem:[#allocation22_spill] sm:$0xff] }
  0xde   :  { %v1464_v5 = vpop.eup %1463  ;;  %v784_v61 = vsub.f32 2.0, %v752_v37  ;;  %v798_v22 = vsel %vm766_vm5, %v782_v56, %v750_v44  ;;  %vm771_vm10 = vcmp.ge.f32.partialorder %v3393_v38, 0.0  ;;  %vm772_vm11 = vcmp.ge.f32.partialorder %v3394_v57, 0.0 }
  0xdf   :  { %v815_v29 = vmul.f32 0.5, %v3395_v8  ;;  %v2465_v10 = vmul.f32 %v813_v11, %v797_v41  ;;  %1475 = vpow2.f32 %v745_v6  ;;  %v755_v43 = vmul.f32 %v1462_v0, %v2412_v36 }
  0xe0   :  { %v785_v60 = vsub.f32 2.0, %v753_v27  ;;  %v799_v1 = vsel %vm767_vm6, %v783_v17, %v751_v55  ;;  %v1466_v46 = vpop.eup %1465  ;;  %v756_v13 = vmul.f32 %v1464_v5, %v2415_v28  ;;  %vm773_vm12 = vcmp.ge.f32.partialorder %v3396_v15, 0.0 }
  0xe1   :  { %v816_v7 = vmul.f32 0.5, %v3397_v3  ;;  %v2473_v34 = vmul.f32 %v814_v12, %v798_v22  ;;  %v859_v24 = vadd.f32 %v2458_v62, %v2456_v33  ;;  %v1468_v20 = vpop.eup %1467  ;;  %v786_v44 = vsub.f32 2.0, %v754_v25 }
  0xe2   :  { %v800_v36 = vsel %vm768_vm7, %v784_v61, %v752_v37  ;;  %v881_v35 = vmul.f32 %v2456_v33, %v2456_v33  ;;  %v882_v28 = vmul.f32 %v2458_v62, %v2458_v62  ;;  %v1470_v26 = vpop.eup %1469  ;;  %vm774_vm13 = vcmp.ge.f32.partialorder %v3398_v63, 0.0 }
  0xe3   :  { %v817_v6 = vmul.f32 0.5, %v3399_v19  ;;  %v2485_v2 = vmul.f32 %v815_v29, %v799_v1  ;;  %v860_v39 = vadd.f32 %v859_v24, %v2465_v10  ;;  %v757_v55 = vmul.f32 %v1466_v46, %v2418_v16  ;;  %v3405_v24 = vld [vmem:[#allocation31_spill] sm:$0xff]  ;;  %v3407_v19 = vld [vmem:[#allocation33_spill] sm:$0xff] }
  0xe4   :  { %v787_v30 = vsub.f32 2.0, %v755_v43  ;;  %v801_v48 = vsel %vm769_vm8, %v785_v60, %v753_v27  ;;  %v883_v45 = vmul.f32 %v2465_v10, %v2465_v10  ;;  %v758_v31 = vmul.f32 %v1468_v20, %v2422_v4  ;;  %v3402_v4 = vld [vmem:[#allocation23_spill] sm:$0xff] }
  0xe5   :  { %vm775_vm14 = vcmp.ge.f32.partialorder %v3400_v18, 0.0  ;;  %v818_v42 = vmul.f32 0.5, %v3401_v32  ;;  %v2496_v51 = vmul.f32 %v816_v7, %v800_v36  ;;  %v861_v37 = vadd.f32 %v860_v39, %v2473_v34  ;;  %v1472_v56 = vpop.eup %1471  ;;  %v3410_v18 = vld [vmem:[#allocation52_spill] sm:$0xff] }
  0xe6   :  { %v788_v14 = vsub.f32 2.0, %v756_v13  ;;  %v802_v16 = vsel %vm770_vm9, %v786_v44, %v754_v25  ;;  %v884_v59 = vmul.f32 %v2473_v34, %v2473_v34  ;;  %v897_v21 = vadd.f32 %v882_v28, %v881_v35 }
  0xe7   :  { %v759_v53 = vmul.f32 %v1470_v26, %v2425_v58  ;;  %v819_v52 = vmul.f32 0.5, %v3402_v4  ;;  %v2505_v49 = vmul.f32 %v817_v6, %v801_v48  ;;  %v862_v47 = vadd.f32 %v861_v37, %v2485_v2  ;;  %v1474_v11 = vpop.eup %1473  ;;  %v3406_v26 = vld [vmem:[#allocation50_spill] sm:$0xff] }
  0xe8   :  { %v789_v27 = vsub.f32 2.0, %v757_v55  ;;  %v803_v17 = vsel %vm771_vm10, %v787_v30, %v755_v43  ;;  %v885_v41 = vmul.f32 %v2485_v2, %v2485_v2  ;;  %v898_v0 = vadd.f32 %v897_v21, %v883_v45  ;;  %v3404_v43 = vld [vmem:[#allocation30_spill] sm:$0xff]  ;;  %v3408_v45 = vld [vmem:[#allocation51_spill] sm:$0xff] }
  0xe9   :  { %v760_v50 = vmul.f32 %v1472_v56, %v2429_v54  ;;  %v820_v12 = vmul.f32 0.5, %v3403_v40  ;;  %v2514_v58 = vmul.f32 %v818_v42, %v802_v16  ;;  %v863_v5 = vadd.f32 %v862_v47, %v2496_v51  ;;  %v1476_v25 = vpop.eup %1475  ;;  %v3411_v21 = vld [vmem:[#allocation39_spill] sm:$0xff] }
  0xea   :  { %v790_v61 = vsub.f32 2.0, %v758_v31  ;;  %v804_v22 = vsel %vm772_vm11, %v788_v14, %v756_v13  ;;  %v886_v38 = vmul.f32 %v2496_v51, %v2496_v51  ;;  %v899_v8 = vadd.f32 %v898_v0, %v884_v59 }
  0xeb   :  { %v761_v29 = vmul.f32 %v1474_v11, %v2433_v23  ;;  %v821_v60 = vmul.f32 0.5, %v3404_v43  ;;  %v2523_v54 = vmul.f32 %v819_v52, %v803_v17  ;;  %v864_v1 = vadd.f32 %v863_v5, %v2505_v49  ;;  %v3412_v17 = vld [vmem:[#allocation46_spill] sm:$0xff] }
  0xec   :  { %v791_v46 = vsub.f32 2.0, %v759_v53  ;;  %v805_v3 = vsel %vm773_vm12, %v789_v27, %v757_v55  ;;  %v887_v57 = vmul.f32 %v2505_v49, %v2505_v49  ;;  %v900_v13 = vadd.f32 %v899_v8, %v885_v41 }
  0xed   :  { %v762_v7 = vmul.f32 %v1476_v25, %v2436_v9  ;;  %v822_v20 = vmul.f32 0.5, %v3405_v24  ;;  %v2532_v44 = vmul.f32 %v820_v12, %v804_v22  ;;  %v865_v23 = vadd.f32 %v864_v1, %v2514_v58 }
  0xee   :  { %v792_v36 = vsub.f32 2.0, %v760_v50  ;;  %v806_v35 = vsel %vm774_vm13, %v790_v61, %v758_v31  ;;  %v888_v15 = vmul.f32 %v2514_v58, %v2514_v58  ;;  %v901_v28 = vadd.f32 %v900_v13, %v886_v38  ;;  %v3409_v31 = vld [vmem:[#allocation36_spill] sm:$0xff] }
  0xef   :  { %vm776_vm15 = vcmp.ge.f32.partialorder %v3406_v26, 0.0  ;;  %v823_v6 = vmul.f32 0.5, %v3407_v19  ;;  %v2541_v39 = vmul.f32 %v821_v60, %v805_v3  ;;  %v866_v9 = vadd.f32 %v865_v23, %v2523_v54 }
  0xf0   :  { %v793_v55 = vsub.f32 2.0, %v761_v29  ;;  %v807_v30 = vsel %vm775_vm14, %v791_v46, %v759_v53  ;;  %v889_v63 = vmul.f32 %v2523_v54, %v2523_v54  ;;  %v902_v48 = vadd.f32 %v901_v28, %v887_v57 }
  0xf1   :  { %vm777_vm2 = vcmp.ge.f32.partialorder %v3408_v45, 0.0  ;;  %v824_v32 = vmul.f32 0.5, %v3409_v31  ;;  %v2550_v42 = vmul.f32 %v822_v20, %v806_v35  ;;  %v867_v37 = vadd.f32 %v866_v9, %v2532_v44 }
  0xf2   :  { %v794_v56 = vsub.f32 2.0, %v762_v7  ;;  %v808_v14 = vsel %vm776_vm15, %v792_v36, %v760_v50  ;;  %v890_v16 = vmul.f32 %v2532_v44, %v2532_v44  ;;  %v903_v59 = vadd.f32 %v902_v48, %v888_v15 }
  0xf3   :  { %vm778_vm3 = vcmp.ge.f32.partialorder %v3410_v18, 0.0  ;;  %v825_v53 = vmul.f32 0.5, %v3411_v21  ;;  %v2557_v4 = vmul.f32 %v823_v6, %v807_v30  ;;  %v868_v52 = vadd.f32 %v867_v37, %v2541_v39  ;;  %v3413_v18 = vld [vmem:[#allocation16_spill] sm:$0xff] }
  0xf4   :  { %v809_v47 = vsel %vm777_vm2, %v793_v55, %v761_v29  ;;  %v891_v11 = vmul.f32 %v2541_v39, %v2541_v39  ;;  %v904_v27 = vadd.f32 %v903_v59, %v889_v63  ;;  %v826_v41 = vmul.f32 0.5, %v3412_v17  ;;  %v1479_v59 = vld [vmem:[#allocation6 + $0x8] sm:$0xff] }
  0xf5   :  { %v2563_v0 = vmul.f32 %v824_v32, %v808_v14  ;;  %v869_v50 = vadd.f32 %v868_v52, %v2550_v42  ;;  %v810_v40 = vsel %vm778_vm3, %v794_v56, %v762_v7  ;;  %v892_v12 = vmul.f32 %v2550_v42, %v2550_v42  ;;  %v42_v14 = vld [vmem:[#allocation6 + $0x10] sm:$0x3f]  ;;  %v3417_v17 = vld [vmem:[#allocation14_spill] sm:$0xff] }
  0xf6   :  { %v905_v5 = vadd.f32 %v904_v27, %v890_v16  ;;  %v2568_v25 = vmul.f32 %v825_v53, %v809_v47  ;;  %v893_v22 = vmul.f32 %v2557_v4, %v2557_v4  ;;  %v2573_v8 = vmul.f32 %v826_v41, %v810_v40  ;;  %v3414_v53 = vld [vmem:[#allocation17_spill] sm:$0xff]  ;;  %v3415_v47 = vld [vmem:[#allocation18_spill] sm:$0xff] }
  0xf7   :  { %v870_v61 = vadd.f32 %v869_v50, %v2557_v4  ;;  %v894_v43 = vmul.f32 %v2563_v0, %v2563_v0  ;;  %v2585_v21 = vrot.slane %v1479_v59, %v3413_v18  ;;  %v2588_v52 = vrot.slane %v42_v14, %v3414_v53  ;;  %v3419_v50 = vld [vmem:[#allocation12_spill] sm:$0xff] }
  0xf8   :  { %v906_v38 = vadd.f32 %v905_v5, %v891_v11  ;;  %v895_v46 = vmul.f32 %v2568_v25, %v2568_v25  ;;  %v896_v13 = vmul.f32 %v2573_v8, %v2573_v8  ;;  %v2591_v11 = vrot.slane %v1479_v59, %v3415_v47 }
  0xf9   :  { %v871_v29 = vadd.f32 %v870_v61, %v2563_v0  ;;  %v2594_v41 = vrot.slane %v42_v14, %v3417_v17  ;;  %v3420_v40 = vsub.s32 6, %v3419_v50  ;;  %v2601_v5 = vrot.slane %v42_v14, %v3413_v18 }
  0xfa   :  { %v907_v60 = vadd.f32 %v906_v38, %v892_v12  ;;  %3416 = vst [vmem:[#allocation53_spill] sm:$0xff] %v2591_v11  ;;  %v3423_v38 = vsub.s32 7, %v3419_v50 }
  0xfb   :  { %v872_v1 = vadd.f32 %v871_v29, %v2568_v25  ;;  %3418 = vst [vmem:[#allocation28_spill] sm:$0xff] %v2594_v41  ;;  %v2598_v12 = vrot.slane %v1479_v59, %v3420_v40  ;;  %3422 = vst [vmem:[#allocation24_spill] sm:$0xff] %v2601_v5 }
  0xfc   :  { %v908_v3 = vadd.f32 %v907_v60, %v893_v22  ;;  %v2606_v29 = vrot.slane %v1479_v59, %v3423_v38  ;;  %v2612_v60 = vmul.f32 0.0, %v2588_v52 }
  0xfd   :  { %v873_v57 = vadd.f32 %v872_v1, %v2573_v8  ;;  %3421 = vst [vmem:[#allocation29_spill] sm:$0xff] %v2598_v12  ;;  %v2615_v1 = vmul.f32 0.0, %v2591_v11 }
  0xfe   :  { %v909_v7 = vadd.f32 %v908_v3, %v894_v43  ;;  %v2609_v43 = vmul.f32 0.0, %v2585_v21 }
  0xff   :  { %v874_v24 = vrot.slane %v873_v57, 4  ;;  %3424 = vst [vmem:[#allocation32_spill] sm:$0xff] %v2615_v1 }
 0x100   :  { %v910_v20 = vadd.f32 %v909_v7, %v895_v46  ;;  %v3425_v46 = vld [vmem:[#allocation13_spill] sm:$0xff]  ;;  %v2624_v7 = vmul.f32 0.0, %v2598_v12 }
 0x101   :  { %v875_v23 = vadd.f32 %v874_v24, %v873_v57  ;;  %v2618_v3 = vrot.slane %v42_v14, %v3425_v46  ;;  %v3429_v24 = vld [vmem:[#allocation15_spill] sm:$0xff] }
 0x102   :  { %v911_v36 = vadd.f32 %v910_v20, %v896_v13  ;;  %v2621_v13 = vmul.f32 0.0, %v2594_v41  ;;  %3428 = vst [vmem:[#allocation34_spill] sm:$0xff] %v2624_v7  ;;  %v2627_v20 = vrot.slane %v42_v14, %v3429_v24 }
 0x103   :  { %v876_v35 = vrot.slane %v875_v23, 2  ;;  %3426 = vst [vmem:[#allocation41_spill] sm:$0xff] %v2618_v3 }
 0x104   :  { %v912_v15 = vrot.slane %v911_v36, 4  ;;  %3427 = vst [vmem:[#allocation42_spill] sm:$0xff] %v2621_v13  ;;  %3430 = vst [vmem:[#allocation35_spill] sm:$0xff] %v2627_v20 }
 0x105   :  { %v877_v28 = vadd.f32 %v876_v35, %v875_v23  ;;  %v2632_v35 = vmul.f32 0.0, %v2601_v5 }
 0x106   :  { %v913_v26 = vadd.f32 %v912_v15, %v911_v36  ;;  %v2635_v15 = vrot.slane %v42_v14, %v3415_v47 }
 0x107   :  { %v878_v19 = vrot.slane %v877_v28, 1  ;;  %3431 = vst [vmem:[#allocation37_spill] sm:$0xff] %v2632_v35 }
 0x108   :  { %v914_v6 = vrot.slane %v913_v26, 2  ;;  %3432 = vst [vmem:[#allocation43_spill] sm:$0xff] %v2635_v15 }
 0x109   :  { %v879_v9 = vadd.f32 %v878_v19, %v877_v28 }
 0x10a   :  { %v915_v55 = vadd.f32 %v914_v6, %v913_v26 }
 0x10b   :  { %v919_v30 = vmul.f32 0.0078125, %v879_v9 }
 0x10c   :  { %v916_v63 = vrot.slane %v915_v55, 1 }
 0x10d   :  { %v921_v45 = vmul.f32 %v919_v30, %v919_v30 }
 0x10e   :  { %v917_v48 = vadd.f32 %v916_v63, %v915_v55 }
 0x110   :  { %v920_v31 = vmul.f32 0.0078125, %v917_v48 }
 0x112   :  { %v922_v32 = vsub.f32 %v920_v31, %v921_v45 }
 0x114   :  { %v923_v37 = vmax.f32 %v922_v32, 0.0 }
 0x116   :  { %v924_v56 = vadd.f32 1e-05, %v923_v37 }
 0x118   :  { %1477 = vrsqrt.f32 %v924_v56 }
 0x122   :  { %v1478_v16 = vpop.eup %1477 }
 0x123   :  { %v926_v27 = vmul.f32 %v1479_v59, %v1478_v16 }
 0x125   :  { %v927_v61 = vmul.f32 %v926_v27, %v919_v30  ;;  %v951_v22 = vrot.slane %v926_v27, %v3414_v53 }
 0x127   :  { %v929_v57 = vrot.slane %v927_v61, 7  ;;  %v952_v23 = vmul.f32 %v951_v22, %v2456_v33  ;;  %v953_v36 = vmul.f32 %v951_v22, %v2458_v62  ;;  %v954_v26 = vmul.f32 %v951_v22, %v2465_v10 }
 0x128   :  { %v955_v19 = vmul.f32 %v951_v22, %v2473_v34  ;;  %v956_v6 = vmul.f32 %v951_v22, %v2485_v2  ;;  %v957_v9 = vmul.f32 %v951_v22, %v2496_v51  ;;  %v958_v55 = vmul.f32 %v951_v22, %v2505_v49 }
 0x129   :  { %v931_v28 = vsub.f32 %v1479_v59, %v929_v57  ;;  %v959_v33 = vmul.f32 %v951_v22, %v2514_v58  ;;  %v960_v62 = vmul.f32 %v951_v22, %v2523_v54  ;;  %v961_v30 = vmul.f32 %v951_v22, %v2532_v44 }
 0x12a   :  { %v962_v63 = vmul.f32 %v951_v22, %v2541_v39  ;;  %v963_v48 = vmul.f32 %v951_v22, %v2550_v42  ;;  %v964_v34 = vmul.f32 %v951_v22, %v2557_v4  ;;  %v965_v2 = vmul.f32 %v951_v22, %v2563_v0 }
 0x12b   :  { %v971_v10 = vrot.slane %v931_v28, %v3417_v17  ;;  %v966_v51 = vmul.f32 %v951_v22, %v2568_v25  ;;  %v967_v49 = vmul.f32 %v951_v22, %v2573_v8 }
 0x12d   :  { %v2652_v45 = vadd.f32 %v971_v10, %v952_v23  ;;  %v2654_v58 = vadd.f32 %v971_v10, %v953_v36  ;;  %v2656_v54 = vadd.f32 %v971_v10, %v954_v26  ;;  %v2658_v44 = vadd.f32 %v971_v10, %v955_v19 }
 0x12e   :  { %v2660_v39 = vadd.f32 %v971_v10, %v956_v6  ;;  %v2662_v42 = vadd.f32 %v971_v10, %v957_v9  ;;  %v2664_v31 = vadd.f32 %v971_v10, %v958_v55  ;;  %v2666_v4 = vadd.f32 %v971_v10, %v959_v33 }
 0x12f   :  { %3433 = vst [vmem:[#allocation38_spill] sm:$0xff] %v2652_v45  ;;  %v2668_v0 = vadd.f32 %v971_v10, %v960_v62  ;;  %v2670_v25 = vadd.f32 %v971_v10, %v961_v30  ;;  %v2672_v8 = vadd.f32 %v971_v10, %v962_v63  ;;  %v2674_v32 = vadd.f32 %v971_v10, %v963_v48 }
 0x130   :  { %v2676_v37 = vadd.f32 %v971_v10, %v964_v34  ;;  %v2678_v56 = vadd.f32 %v971_v10, %v965_v2  ;;  %v2680_v14 = vadd.f32 %v971_v10, %v966_v51  ;;  %v2682_v16 = vadd.f32 %v971_v10, %v967_v49 }
 0x131   :  { %3434 = vst [vmem:[#allocation44_spill] sm:$0xff] %v2668_v0  ;;  %v993_v59 = vmul.f32 %v2585_v21, %v2652_v45  ;;  %v994_v18 = vmul.f32 %v2585_v21, %v2654_v58  ;;  %v995_v53 = vmul.f32 %v2585_v21, %v2656_v54  ;;  %v996_v47 = vmul.f32 %v2585_v21, %v2658_v44 }
 0x132   :  { %v997_v27 = vmul.f32 %v2585_v21, %v2660_v39  ;;  %v998_v17 = vmul.f32 %v2585_v21, %v2662_v42  ;;  %v999_v50 = vmul.f32 %v2585_v21, %v2664_v31  ;;  %v1000_v40 = vmul.f32 %v2585_v21, %v2668_v0 }
 0x133   :  { %v1001_v61 = vmul.f32 %v2585_v21, %v2670_v25  ;;  %v1002_v22 = vmul.f32 %v2585_v21, %v2672_v8  ;;  %v1003_v38 = vmul.f32 %v2585_v21, %v2674_v32  ;;  %v1004_v46 = vmul.f32 %v2585_v21, %v2676_v37 }
 0x134   :  { %v1005_v57 = vmul.f32 %v2585_v21, %v2678_v56  ;;  %v1006_v24 = vmul.f32 %v2585_v21, %v2680_v14  ;;  %v1011_v23 = vmul.f32 %v2606_v29, %v2652_v45  ;;  %v1012_v36 = vmul.f32 %v2606_v29, %v2654_v58 }
 0x135   :  { %v1013_v28 = vmul.f32 %v2606_v29, %v2656_v54  ;;  %v1014_v26 = vmul.f32 %v2606_v29, %v2658_v44  ;;  %v1015_v19 = vmul.f32 %v2606_v29, %v2660_v39  ;;  %v1016_v6 = vmul.f32 %v2606_v29, %v2662_v42 }
 0x136   :  { %v1017_v21 = vmul.f32 %v2606_v29, %v2664_v31  ;;  %v1018_v9 = vmul.f32 %v2606_v29, %v2666_v4  ;;  %v1019_v55 = vmul.f32 %v2606_v29, %v2668_v0  ;;  %v1020_v33 = vmul.f32 %v2606_v29, %v2670_v25 }
 0x137   :  { %v1021_v62 = vmul.f32 %v2606_v29, %v2672_v8  ;;  %v1022_v30 = vmul.f32 %v2606_v29, %v2674_v32  ;;  %v1023_v63 = vmul.f32 %v2606_v29, %v2676_v37  ;;  %v1024_v48 = vmul.f32 %v2606_v29, %v2678_v56 }
 0x138   :  { %v1025_v10 = vmul.f32 %v2606_v29, %v2680_v14  ;;  %v1026_v34 = vmul.f32 %v2606_v29, %v2682_v16  ;;  %v1027_v2 = vadd.f32 %v1011_v23, %v2609_v43  ;;  %v1028_v51 = vadd.f32 %v1012_v36, %v993_v59 }
 0x139   :  { %v1029_v49 = vadd.f32 %v1013_v28, %v994_v18  ;;  %v1030_v15 = vadd.f32 %v1014_v26, %v995_v53  ;;  %v1031_v35 = vadd.f32 %v1015_v19, %v996_v47  ;;  %v1032_v5 = vadd.f32 %v1016_v6, %v997_v27 }
 0x13a   :  { %v1033_v7 = vadd.f32 %v1017_v21, %v998_v17  ;;  %v1034_v20 = vadd.f32 %v1018_v9, %v999_v50  ;;  %v1035_v12 = vadd.f32 %v1019_v55, %v2609_v43  ;;  %v1036_v13 = vadd.f32 %v1020_v33, %v1000_v40 }
 0x13b   :  { %v1037_v41 = vadd.f32 %v1021_v62, %v1001_v61  ;;  %v1038_v1 = vadd.f32 %v1022_v30, %v1002_v22  ;;  %v1039_v3 = vadd.f32 %v1023_v63, %v1003_v38  ;;  %v1040_v0 = vadd.f32 %v1024_v48, %v1004_v46 }
 0x13c   :  { %v1041_v11 = vadd.f32 %v1025_v10, %v1005_v57  ;;  %v1042_v45 = vadd.f32 %v1026_v34, %v1006_v24  ;;  %v1047_v29 = vmul.f32 %v2588_v52, %v2654_v58  ;;  %v1048_v59 = vmul.f32 %v2588_v52, %v2656_v54 }
 0x13d   :  { %v1049_v18 = vmul.f32 %v2588_v52, %v2658_v44  ;;  %v1050_v53 = vmul.f32 %v2588_v52, %v2660_v39  ;;  %v1051_v43 = vmul.f32 %v2588_v52, %v2662_v42  ;;  %v1052_v47 = vmul.f32 %v2588_v52, %v2664_v31 }
 0x13e   :  { %v1053_v27 = vmul.f32 %v2588_v52, %v2666_v4  ;;  %v1055_v17 = vmul.f32 %v2588_v52, %v2670_v25  ;;  %v1056_v50 = vmul.f32 %v2588_v52, %v2672_v8  ;;  %v1057_v40 = vmul.f32 %v2588_v52, %v2674_v32 }
 0x13f   :  { %v1058_v61 = vmul.f32 %v2588_v52, %v2676_v37  ;;  %v1059_v22 = vmul.f32 %v2588_v52, %v2678_v56  ;;  %v1060_v38 = vmul.f32 %v2588_v52, %v2680_v14  ;;  %v1061_v46 = vmul.f32 %v2588_v52, %v2682_v16 }
 0x140   :  { %v1062_v57 = vadd.f32 %v1047_v29, %v1027_v2  ;;  %v1063_v24 = vadd.f32 %v1048_v59, %v1028_v51  ;;  %v1064_v23 = vadd.f32 %v1049_v18, %v1029_v49  ;;  %v1065_v36 = vadd.f32 %v1050_v53, %v1030_v15 }
 0x141   :  { %v1066_v28 = vadd.f32 %v1051_v43, %v1031_v35  ;;  %v1067_v26 = vadd.f32 %v1052_v47, %v1032_v5  ;;  %v1068_v19 = vadd.f32 %v1053_v27, %v1033_v7  ;;  %v1069_v6 = vadd.f32 %v2612_v60, %v1034_v20 }
 0x142   :  { %v1070_v21 = vadd.f32 %v1055_v17, %v1035_v12  ;;  %v1071_v9 = vadd.f32 %v1056_v50, %v1036_v13  ;;  %v1072_v55 = vadd.f32 %v1057_v40, %v1037_v41  ;;  %v1073_v33 = vadd.f32 %v1058_v61, %v1038_v1 }
 0x143   :  { %v1074_v62 = vadd.f32 %v1059_v22, %v1039_v3  ;;  %v1075_v30 = vadd.f32 %v1060_v38, %v1040_v0  ;;  %v1076_v63 = vadd.f32 %v1061_v46, %v1041_v11  ;;  %v1077_v48 = vadd.f32 %v2612_v60, %v1042_v45  ;;  %v3451_v46 = vld [vmem:[#allocation38_spill] sm:$0xff] }
 0x144   :  { %v1078_v10 = vrot.slane %v1062_v57, 7  ;;  %v1079_v52 = vrot.slane %v1063_v24, 7  ;;  %v1080_v34 = vrot.slane %v1064_v23, 7  ;;  %v1081_v2 = vrot.slane %v1065_v36, 7  ;;  %v3452_v57 = vld [vmem:[#allocation53_spill] sm:$0xff] }
 0x145   :  { %v1082_v51 = vrot.slane %v1066_v28, 7  ;;  %v1083_v15 = vrot.slane %v1067_v26, 7  ;;  %v1084_v35 = vrot.slane %v1068_v19, 7  ;;  %v1085_v5 = vrot.slane %v1069_v6, 7 }
 0x146   :  { %v1086_v7 = vrot.slane %v1070_v21, 7  ;;  %v1087_v49 = vrot.slane %v1071_v9, 7  ;;  %v1088_v20 = vrot.slane %v1072_v55, 7  ;;  %v1089_v12 = vrot.slane %v1073_v33, 7  ;;  %v3453_v21 = vld [vmem:[#allocation44_spill] sm:$0xff] }
 0x147   :  { %v1090_v13 = vrot.slane %v1074_v62, 7  ;;  %v1091_v41 = vrot.slane %v1075_v30, 7  ;;  %v1092_v1 = vrot.slane %v1076_v63, 7  ;;  %v1093_v3 = vrot.slane %v1077_v48, 7 }
 0x148   :  { %v2778_v11 = vsel %vm46_vm0, %v1078_v10, 0.0  ;;  %v2782_v60 = vsel %vm46_vm0, %v1079_v52, 0.0  ;;  %v2786_v45 = vsel %vm46_vm0, %v1080_v34, 0.0  ;;  %v2790_v29 = vsel %vm46_vm0, %v1081_v2, 0.0  ;;  %v3454_v10 = vld [vmem:[#allocation41_spill] sm:$0xff] }
 0x149   :  { %3436 = vst [vmem:[#allocation40_spill] sm:$0xff] %v2782_v60  ;;  %3437 = vst [vmem:[#allocation45_spill] sm:$0xff] %v2786_v45  ;;  %v2794_v59 = vsel %vm46_vm0, %v1082_v51, 0.0  ;;  %v2798_v18 = vsel %vm46_vm0, %v1083_v15, 0.0  ;;  %v2802_v53 = vsel %vm46_vm0, %v1084_v35, 0.0  ;;  %v2806_v43 = vsel %vm46_vm0, %v1085_v5, 0.0 }
 0x14a   :  { %3438 = vst [vmem:[#allocation25_spill] sm:$0xff] %v2790_v29  ;;  %3439 = vst [vmem:[#allocation47_spill] sm:$0xff] %v2794_v59  ;;  %v2810_v47 = vsel %vm46_vm0, %v1086_v7, 0.0  ;;  %v2814_v27 = vsel %vm46_vm0, %v1087_v49, 0.0  ;;  %v2818_v17 = vsel %vm46_vm0, %v1088_v20, 0.0  ;;  %v2822_v50 = vsel %vm46_vm0, %v1089_v12, 0.0 }
 0x14b   :  { %3440 = vst [vmem:[#allocation20_spill] sm:$0xff] %v2798_v18  ;;  %3441 = vst [vmem:[#allocation48_spill] sm:$0xff] %v2802_v53  ;;  %v2826_v40 = vsel %vm46_vm0, %v1090_v13, 0.0  ;;  %v2830_v61 = vsel %vm46_vm0, %v1091_v41, 0.0  ;;  %v2834_v22 = vsel %vm46_vm0, %v1092_v1, 0.0  ;;  %v2838_v38 = vsel %vm46_vm0, %v1093_v3, 0.0 }
 0x14c   :  { %3442 = vst [vmem:[#allocation26_spill] sm:$0xff] %v2806_v43  ;;  %3443 = vst [vmem:[#allocation49_spill] sm:$0xff] %v2810_v47  ;;  %v1115_v24 = vmul.f32 %v3452_v57, %v3451_v46  ;;  %v1116_v23 = vmul.f32 %v3452_v57, %v2654_v58  ;;  %v1117_v36 = vmul.f32 %v3452_v57, %v2656_v54 }
 0x14d   :  { %3444 = vst [vmem:[#allocation22_spill] sm:$0xff] %v2814_v27  ;;  %3445 = vst [vmem:[#allocation23_spill] sm:$0xff] %v2818_v17  ;;  %v1118_v28 = vmul.f32 %v3452_v57, %v2658_v44  ;;  %v1119_v26 = vmul.f32 %v3452_v57, %v2660_v39  ;;  %v1120_v19 = vmul.f32 %v3452_v57, %v2662_v42 }
 0x14e   :  { %3446 = vst [vmem:[#allocation27_spill] sm:$0xff] %v2822_v50  ;;  %3447 = vst [vmem:[#allocation30_spill] sm:$0xff] %v2826_v40  ;;  %v1121_v6 = vmul.f32 %v3452_v57, %v2664_v31  ;;  %v1122_v9 = vmul.f32 %v3452_v57, %v3453_v21  ;;  %v1123_v55 = vmul.f32 %v3452_v57, %v2670_v25 }
 0x14f   :  { %3448 = vst [vmem:[#allocation31_spill] sm:$0xff] %v2830_v61  ;;  %3449 = vst [vmem:[#allocation50_spill] sm:$0xff] %v2834_v22  ;;  %v1124_v33 = vmul.f32 %v3452_v57, %v2672_v8  ;;  %v1125_v62 = vmul.f32 %v3452_v57, %v2674_v32  ;;  %v1126_v30 = vmul.f32 %v3452_v57, %v2676_v37 }
 0x150   :  { %3450 = vst [vmem:[#allocation33_spill] sm:$0xff] %v2838_v38  ;;  %v1127_v63 = vmul.f32 %v3452_v57, %v2678_v56  ;;  %v1128_v48 = vmul.f32 %v3452_v57, %v2680_v14  ;;  %v1133_v52 = vmul.f32 %v3454_v10, %v3451_v46  ;;  %v1134_v34 = vmul.f32 %v3454_v10, %v2654_v58  ;;  %v3455_v57 = vld [vmem:[#allocation32_spill] sm:$0xff] }
 0x151   :  { %v1135_v2 = vmul.f32 %v3454_v10, %v2656_v54  ;;  %v1136_v51 = vmul.f32 %v3454_v10, %v2658_v44  ;;  %v1137_v15 = vmul.f32 %v3454_v10, %v2660_v39  ;;  %v1138_v35 = vmul.f32 %v3454_v10, %v2662_v42 }
 0x152   :  { %v1139_v5 = vmul.f32 %v3454_v10, %v2664_v31  ;;  %v1140_v7 = vmul.f32 %v3454_v10, %v2666_v4  ;;  %v1141_v49 = vmul.f32 %v3454_v10, %v3453_v21  ;;  %v1142_v20 = vmul.f32 %v3454_v10, %v2670_v25 }
 0x153   :  { %v1143_v12 = vmul.f32 %v3454_v10, %v2672_v8  ;;  %v1144_v13 = vmul.f32 %v3454_v10, %v2674_v32  ;;  %v1145_v41 = vmul.f32 %v3454_v10, %v2676_v37  ;;  %v1146_v1 = vmul.f32 %v3454_v10, %v2678_v56 }
 0x154   :  { %v1147_v3 = vmul.f32 %v3454_v10, %v2680_v14  ;;  %v1148_v0 = vmul.f32 %v3454_v10, %v2682_v16  ;;  %v1149_v21 = vadd.f32 %v1133_v52, %v3455_v57  ;;  %v1150_v46 = vadd.f32 %v1134_v34, %v1115_v24  ;;  %v3456_v10 = vld [vmem:[#allocation28_spill] sm:$0xff] }
 0x155   :  { %v1151_v38 = vadd.f32 %v1135_v2, %v1116_v23  ;;  %v1152_v22 = vadd.f32 %v1136_v51, %v1117_v36  ;;  %v1153_v61 = vadd.f32 %v1137_v15, %v1118_v28  ;;  %v1154_v40 = vadd.f32 %v1138_v35, %v1119_v26 }
 0x156   :  { %v1155_v50 = vadd.f32 %v1139_v5, %v1120_v19  ;;  %v1156_v17 = vadd.f32 %v1140_v7, %v1121_v6  ;;  %v1157_v27 = vadd.f32 %v1141_v49, %v3455_v57  ;;  %v1158_v47 = vadd.f32 %v1142_v20, %v1122_v9  ;;  %v3457_v5 = vld [vmem:[#allocation42_spill] sm:$0xff] }
 0x157   :  { %v1159_v43 = vadd.f32 %v1143_v12, %v1123_v55  ;;  %v1160_v53 = vadd.f32 %v1144_v13, %v1124_v33  ;;  %v1161_v18 = vadd.f32 %v1145_v41, %v1125_v62  ;;  %v1162_v59 = vadd.f32 %v1146_v1, %v1126_v30 }
 0x158   :  { %v1163_v29 = vadd.f32 %v1147_v3, %v1127_v63  ;;  %v1164_v45 = vadd.f32 %v1148_v0, %v1128_v48  ;;  %v1169_v60 = vmul.f32 %v3456_v10, %v2654_v58  ;;  %v1170_v24 = vmul.f32 %v3456_v10, %v2656_v54 }
 0x159   :  { %v1171_v23 = vmul.f32 %v3456_v10, %v2658_v44  ;;  %v1172_v36 = vmul.f32 %v3456_v10, %v2660_v39  ;;  %v1173_v28 = vmul.f32 %v3456_v10, %v2662_v42  ;;  %v1174_v26 = vmul.f32 %v3456_v10, %v2664_v31 }
 0x15a   :  { %v1175_v19 = vmul.f32 %v3456_v10, %v2666_v4  ;;  %v1177_v6 = vmul.f32 %v3456_v10, %v2670_v25  ;;  %v1178_v9 = vmul.f32 %v3456_v10, %v2672_v8  ;;  %v1179_v55 = vmul.f32 %v3456_v10, %v2674_v32 }
 0x15b   :  { %v1180_v33 = vmul.f32 %v3456_v10, %v2676_v37  ;;  %v1181_v62 = vmul.f32 %v3456_v10, %v2678_v56  ;;  %v1182_v30 = vmul.f32 %v3456_v10, %v2680_v14  ;;  %v1183_v63 = vmul.f32 %v3456_v10, %v2682_v16  ;;  %v3476_v10 = vld [vmem:[#allocation23_spill] sm:$0xff] }
 0x15c   :  { %v1184_v48 = vadd.f32 %v1169_v60, %v1149_v21  ;;  %v1185_v52 = vadd.f32 %v1170_v24, %v1150_v46  ;;  %v1186_v34 = vadd.f32 %v1171_v23, %v1151_v38  ;;  %v1187_v2 = vadd.f32 %v1172_v36, %v1152_v22  ;;  %v3458_v60 = vld [vmem:[#allocation40_spill] sm:$0xff]  ;;  %v3474_v46 = vld [vmem:[#allocation22_spill] sm:$0xff]  ;;  %v3478_v23 = vld [vmem:[#allocation27_spill] sm:$0xff] }
 0x15d   :  { %v1188_v51 = vadd.f32 %v1173_v28, %v1153_v61  ;;  %v1189_v15 = vadd.f32 %v1174_v26, %v1154_v40  ;;  %v1190_v35 = vadd.f32 %v1175_v19, %v1155_v50  ;;  %v1191_v7 = vadd.f32 %v3457_v5, %v1156_v17  ;;  %v3460_v61 = vld [vmem:[#allocation45_spill] sm:$0xff]  ;;  %v3480_v28 = vld [vmem:[#allocation30_spill] sm:$0xff]  ;;  %v3482_v19 = vld [vmem:[#allocation31_spill] sm:$0xff] }
 0x15e   :  { %v1192_v49 = vadd.f32 %v1177_v6, %v1157_v27  ;;  %v1193_v20 = vadd.f32 %v1178_v9, %v1158_v47  ;;  %v1194_v12 = vadd.f32 %v1179_v55, %v1159_v43  ;;  %v1195_v13 = vadd.f32 %v1180_v33, %v1160_v53  ;;  %v3462_v50 = vld [vmem:[#allocation25_spill] sm:$0xff]  ;;  %v3464_v47 = vld [vmem:[#allocation47_spill] sm:$0xff]  ;;  %v3484_v9 = vld [vmem:[#allocation50_spill] sm:$0xff] }
 0x15f   :  { %v1196_v41 = vadd.f32 %v1181_v62, %v1161_v18  ;;  %v1197_v1 = vadd.f32 %v1182_v30, %v1162_v59  ;;  %v1198_v3 = vadd.f32 %v1183_v63, %v1163_v29  ;;  %v1199_v0 = vadd.f32 %v3457_v5, %v1164_v45  ;;  %v3466_v18 = vld [vmem:[#allocation20_spill] sm:$0xff]  ;;  %v3472_v27 = vld [vmem:[#allocation49_spill] sm:$0xff]  ;;  %v3488_v30 = vld [vmem:[#allocation38_spill] sm:$0xff] }
 0x160   :  { %v2933_v57 = vadd.f32 %v1184_v48, %v2778_v11  ;;  %v2936_v38 = vadd.f32 %v1185_v52, %v3458_v60  ;;  %v2939_v40 = vadd.f32 %v1186_v34, %v3460_v61  ;;  %v2942_v17 = vadd.f32 %v1187_v2, %v3462_v50  ;;  %v3468_v29 = vld [vmem:[#allocation48_spill] sm:$0xff]  ;;  %v3470_v11 = vld [vmem:[#allocation26_spill] sm:$0xff]  ;;  %v3486_v33 = vld [vmem:[#allocation33_spill] sm:$0xff] }
 0x161   :  { %v2945_v43 = vadd.f32 %v1188_v51, %v3464_v47  ;;  %v2948_v59 = vadd.f32 %v1189_v15, %v3466_v18  ;;  %v2951_v45 = vadd.f32 %v1190_v35, %v3468_v29  ;;  %v2954_v53 = vadd.f32 %v1191_v7, %v3470_v11  ;;  %v3489_v63 = vld [vmem:[#allocation29_spill] sm:$0xff]  ;;  %v3490_v5 = vld [vmem:[#allocation44_spill] sm:$0xff] }
 0x162   :  { %3459 = vst [vmem:[#allocation51_spill] sm:$0xff] %v2936_v38  ;;  %3461 = vst [vmem:[#allocation36_spill] sm:$0xff] %v2939_v40  ;;  %v2957_v22 = vadd.f32 %v1192_v49, %v3472_v27  ;;  %v2960_v21 = vadd.f32 %v1193_v20, %v3474_v46  ;;  %v2963_v24 = vadd.f32 %v1194_v12, %v3476_v10 }
 0x163   :  { %3463 = vst [vmem:[#allocation52_spill] sm:$0xff] %v2942_v17  ;;  %3465 = vst [vmem:[#allocation39_spill] sm:$0xff] %v2945_v43  ;;  %v2966_v36 = vadd.f32 %v1195_v13, %v3478_v23  ;;  %v2969_v26 = vadd.f32 %v1196_v41, %v3480_v28  ;;  %v2972_v6 = vadd.f32 %v1197_v1, %v3482_v19 }
 0x164   :  { %3467 = vst [vmem:[#allocation46_spill] sm:$0xff] %v2948_v59  ;;  %3469 = vst [vmem:[#allocation16_spill] sm:$0xff] %v2951_v45  ;;  %v2975_v55 = vadd.f32 %v1198_v3, %v3484_v9  ;;  %v2978_v62 = vadd.f32 %v1199_v0, %v3486_v33  ;;  %v1221_v48 = vmul.f32 %v3489_v63, %v3488_v30  ;;  %v3491_v3 = vld [vmem:[#allocation35_spill] sm:$0xff] }
 0x165   :  { %3471 = vst [vmem:[#allocation17_spill] sm:$0xff] %v2954_v53  ;;  %3473 = vst [vmem:[#allocation18_spill] sm:$0xff] %v2957_v22  ;;  %v1222_v52 = vmul.f32 %v3489_v63, %v2654_v58  ;;  %v1223_v34 = vmul.f32 %v3489_v63, %v2656_v54  ;;  %v1224_v2 = vmul.f32 %v3489_v63, %v2658_v44 }
 0x166   :  { %3475 = vst [vmem:[#allocation14_spill] sm:$0xff] %v2960_v21  ;;  %3477 = vst [vmem:[#allocation12_spill] sm:$0xff] %v2963_v24  ;;  %v1225_v51 = vmul.f32 %v3489_v63, %v2660_v39  ;;  %v1226_v15 = vmul.f32 %v3489_v63, %v2662_v42  ;;  %v1227_v35 = vmul.f32 %v3489_v63, %v2664_v31 }
 0x167   :  { %3479 = vst [vmem:[#allocation13_spill] sm:$0xff] %v2966_v36  ;;  %3481 = vst [vmem:[#allocation15_spill] sm:$0xff] %v2969_v26  ;;  %v1228_v7 = vmul.f32 %v3489_v63, %v3490_v5  ;;  %v1229_v49 = vmul.f32 %v3489_v63, %v2670_v25  ;;  %v1230_v20 = vmul.f32 %v3489_v63, %v2672_v8 }
 0x168   :  { %3483 = vst [vmem:[#allocation19_spill] sm:$0xff] %v2972_v6  ;;  %3485 = vst [vmem:[#allocation53_spill] sm:$0xff] %v2975_v55  ;;  %v1231_v12 = vmul.f32 %v3489_v63, %v2674_v32  ;;  %v1232_v13 = vmul.f32 %v3489_v63, %v2676_v37  ;;  %v1233_v41 = vmul.f32 %v3489_v63, %v2678_v56 }
 0x169   :  { %3487 = vst [vmem:[#allocation41_spill] sm:$0xff] %v2978_v62  ;;  %v1234_v1 = vmul.f32 %v3489_v63, %v2680_v14  ;;  %v1239_v0 = vmul.f32 %v3491_v3, %v3488_v30  ;;  %v1240_v60 = vmul.f32 %v3491_v3, %v2654_v58  ;;  %v1241_v61 = vmul.f32 %v3491_v3, %v2656_v54  ;;  %v3492_v30 = vld [vmem:[#allocation34_spill] sm:$0xff] }
 0x16a   :  { %v1242_v50 = vmul.f32 %v3491_v3, %v2658_v44  ;;  %v1243_v47 = vmul.f32 %v3491_v3, %v2660_v39  ;;  %v1244_v18 = vmul.f32 %v3491_v3, %v2662_v42  ;;  %v1245_v29 = vmul.f32 %v3491_v3, %v2664_v31 }
 0x16b   :  { %v1246_v11 = vmul.f32 %v3491_v3, %v2666_v4  ;;  %v1247_v27 = vmul.f32 %v3491_v3, %v3490_v5  ;;  %v1248_v46 = vmul.f32 %v3491_v3, %v2670_v25  ;;  %v1249_v10 = vmul.f32 %v3491_v3, %v2672_v8 }
 0x16c   :  { %v1250_v23 = vmul.f32 %v3491_v3, %v2674_v32  ;;  %v1251_v28 = vmul.f32 %v3491_v3, %v2676_v37  ;;  %v1252_v19 = vmul.f32 %v3491_v3, %v2678_v56  ;;  %v1253_v9 = vmul.f32 %v3491_v3, %v2680_v14 }
 0x16d   :  { %v1254_v33 = vmul.f32 %v3491_v3, %v2682_v16  ;;  %v1255_v63 = vadd.f32 %v1239_v0, %v3492_v30  ;;  %v1256_v5 = vadd.f32 %v1240_v60, %v1221_v48  ;;  %v1257_v62 = vadd.f32 %v1241_v61, %v1222_v52  ;;  %v3493_v3 = vld [vmem:[#allocation24_spill] sm:$0xff] }
 0x16e   :  { %v1258_v55 = vadd.f32 %v1242_v50, %v1223_v34  ;;  %v1259_v6 = vadd.f32 %v1243_v47, %v1224_v2  ;;  %v1260_v26 = vadd.f32 %v1244_v18, %v1225_v51  ;;  %v1261_v36 = vadd.f32 %v1245_v29, %v1226_v15 }
 0x16f   :  { %v1262_v24 = vadd.f32 %v1246_v11, %v1227_v35  ;;  %v1263_v21 = vadd.f32 %v1247_v27, %v3492_v30  ;;  %v1264_v22 = vadd.f32 %v1248_v46, %v1228_v7  ;;  %v1265_v53 = vadd.f32 %v1249_v10, %v1229_v49 }
 0x170   :  { %v1266_v45 = vadd.f32 %v1250_v23, %v1230_v20  ;;  %v1267_v59 = vadd.f32 %v1251_v28, %v1231_v12  ;;  %v1268_v43 = vadd.f32 %v1252_v19, %v1232_v13  ;;  %v1269_v17 = vadd.f32 %v1253_v9, %v1233_v41 }
 0x171   :  { %v1270_v40 = vadd.f32 %v1254_v33, %v1234_v1  ;;  %v1275_v38 = vmul.f32 %v3493_v3, %v2654_v58  ;;  %v1276_v48 = vmul.f32 %v3493_v3, %v2656_v54  ;;  %v1277_v52 = vmul.f32 %v3493_v3, %v2658_v44 }
 0x172   :  { %v1278_v34 = vmul.f32 %v3493_v3, %v2660_v39  ;;  %v1279_v2 = vmul.f32 %v3493_v3, %v2662_v42  ;;  %v1280_v51 = vmul.f32 %v3493_v3, %v2664_v31  ;;  %v1281_v15 = vmul.f32 %v3493_v3, %v2666_v4 }
 0x173   :  { %v1283_v58 = vmul.f32 %v3493_v3, %v2670_v25  ;;  %v1284_v54 = vmul.f32 %v3493_v3, %v2672_v8  ;;  %v1285_v44 = vmul.f32 %v3493_v3, %v2674_v32  ;;  %v1286_v39 = vmul.f32 %v3493_v3, %v2676_v37  ;;  %v3494_v32 = vld [vmem:[#allocation37_spill] sm:$0xff] }
 0x174   :  { %v1287_v42 = vmul.f32 %v3493_v3, %v2678_v56  ;;  %v1288_v31 = vmul.f32 %v3493_v3, %v2680_v14  ;;  %v1289_v4 = vmul.f32 %v3493_v3, %v2682_v16  ;;  %v1290_v35 = vadd.f32 %v1275_v38, %v1255_v63 }
 0x175   :  { %v1291_v25 = vadd.f32 %v1276_v48, %v1256_v5  ;;  %v1292_v7 = vadd.f32 %v1277_v52, %v1257_v62  ;;  %v1293_v49 = vadd.f32 %v1278_v34, %v1258_v55  ;;  %v1294_v8 = vadd.f32 %v1279_v2, %v1259_v6  ;;  %v3496_v52 = vld [vmem:[#allocation51_spill] sm:$0xff]  ;;  %v3497_v2 = vld [vmem:[#allocation36_spill] sm:$0xff] }
 0x176   :  { %v1295_v20 = vadd.f32 %v1280_v51, %v1260_v26  ;;  %v1296_v12 = vadd.f32 %v1281_v15, %v1261_v36  ;;  %v1297_v13 = vadd.f32 %v3494_v32, %v1262_v24  ;;  %v1298_v41 = vadd.f32 %v1283_v58, %v1263_v21  ;;  %v3498_v15 = vld [vmem:[#allocation52_spill] sm:$0xff] }
 0x177   :  { %v1299_v37 = vadd.f32 %v1284_v54, %v1264_v22  ;;  %v1300_v1 = vadd.f32 %v1285_v44, %v1265_v53  ;;  %v1301_v0 = vadd.f32 %v1286_v39, %v1266_v45  ;;  %v1302_v56 = vadd.f32 %v1287_v42, %v1267_v59  ;;  %v3499_v54 = vld [vmem:[#allocation39_spill] sm:$0xff]  ;;  %v3500_v39 = vld [vmem:[#allocation46_spill] sm:$0xff] }
 0x178   :  { %v1303_v60 = vadd.f32 %v1288_v31, %v1268_v43  ;;  %v1304_v61 = vadd.f32 %v1289_v4, %v1269_v17  ;;  %v1305_v14 = vadd.f32 %v3494_v32, %v1270_v40  ;;  %v1306_v50 = vrot.slane %v1290_v35, 1  ;;  %v3501_v31 = vld [vmem:[#allocation16_spill] sm:$0xff]  ;;  %v3502_v35 = vld [vmem:[#allocation17_spill] sm:$0xff] }
 0x179   :  { %v1307_v16 = vrot.slane %v1291_v25, 1  ;;  %v1308_v38 = vrot.slane %v1292_v7, 1  ;;  %v1309_v47 = vrot.slane %v1293_v49, 1  ;;  %v1310_v62 = vrot.slane %v1294_v8, 1  ;;  %v3503_v7 = vld [vmem:[#allocation18_spill] sm:$0xff]  ;;  %v3506_v32 = vld [vmem:[#allocation13_spill] sm:$0xff] }
 0x17a   :  { %v1311_v55 = vrot.slane %v1295_v20, 1  ;;  %v1312_v6 = vrot.slane %v1296_v12, 1  ;;  %v1313_v26 = vrot.slane %v1297_v13, 1  ;;  %v1314_v36 = vrot.slane %v1298_v41, 1  ;;  %v3504_v8 = vld [vmem:[#allocation14_spill] sm:$0xff]  ;;  %v3505_v12 = vld [vmem:[#allocation12_spill] sm:$0xff] }
 0x17b   :  { %v1315_v18 = vrot.slane %v1299_v37, 1  ;;  %v1316_v24 = vrot.slane %v1300_v1, 1  ;;  %v1317_v21 = vrot.slane %v1301_v0, 1  ;;  %v1318_v22 = vrot.slane %v1302_v56, 1  ;;  %v3507_v41 = vld [vmem:[#allocation15_spill] sm:$0xff]  ;;  %v3509_v56 = vld [vmem:[#allocation53_spill] sm:$0xff] }
 0x17c   :  { %v1319_v53 = vrot.slane %v1303_v60, 1  ;;  %v1320_v45 = vrot.slane %v1304_v61, 1  ;;  %v1321_v59 = vrot.slane %v1305_v14, 1  ;;  %v1322_v17 = vsel %vm51_vm1, %v1306_v50, 0.0  ;;  %v3508_v1 = vld [vmem:[#allocation19_spill] sm:$0xff]  ;;  %v3510_v61 = vld [vmem:[#allocation41_spill] sm:$0xff] }
 0x17d   :  { %v1323_v40 = vsel %vm51_vm1, %v1307_v16, 0.0  ;;  %v1324_v29 = vsel %vm51_vm1, %v1308_v38, 0.0  ;;  %v1325_v11 = vsel %vm51_vm1, %v1309_v47, 0.0  ;;  %v1326_v27 = vsel %vm51_vm1, %v1310_v62, 0.0  ;;  %v3511_v50 = vld [vmem:[#allocation43_spill] sm:$0xff] }
 0x17e   :  { %v1327_v46 = vsel %vm51_vm1, %v1311_v55, 0.0  ;;  %v1328_v10 = vsel %vm51_vm1, %v1312_v6, 0.0  ;;  %v1329_v23 = vsel %vm51_vm1, %v1313_v26, 0.0  ;;  %v1330_v28 = vsel %vm51_vm1, %v1314_v36, 0.0 }
 0x17f   :  { %v1331_v19 = vsel %vm51_vm1, %v1315_v18, 0.0  ;;  %v1332_v9 = vsel %vm51_vm1, %v1316_v24, 0.0  ;;  %v1333_v33 = vsel %vm51_vm1, %v1317_v21, 0.0  ;;  %v1334_v30 = vsel %vm51_vm1, %v1318_v22, 0.0 }
 0x180   :  { %v1335_v63 = vsel %vm51_vm1, %v1319_v53, 0.0  ;;  %v1336_v5 = vsel %vm51_vm1, %v1320_v45, 0.0  ;;  %v1337_v3 = vsel %vm51_vm1, %v1321_v59, 0.0  ;;  %v1338_v48 = vadd.f32 %v1322_v17, %v2933_v57 }
 0x181   :  { %v1339_v34 = vadd.f32 %v1323_v40, %v3496_v52  ;;  %v1340_v51 = vadd.f32 %v1324_v29, %v3497_v2  ;;  %v1341_v58 = vadd.f32 %v1325_v11, %v3498_v15  ;;  %v1342_v44 = vadd.f32 %v1326_v27, %v3499_v54 }
 0x182   :  { %v1343_v42 = vadd.f32 %v1327_v46, %v3500_v39  ;;  %v1344_v4 = vadd.f32 %v1328_v10, %v3501_v31  ;;  %v1345_v25 = vadd.f32 %v1329_v23, %v3502_v35  ;;  %v1346_v49 = vadd.f32 %v1330_v28, %v3503_v7 }
 0x183   :  { %v1347_v20 = vadd.f32 %v1331_v19, %v3504_v8  ;;  %v1348_v57 = vadd.f32 %v1332_v9, %v3505_v12  ;;  %v1349_v13 = vadd.f32 %v1333_v33, %v3506_v32  ;;  %v1350_v37 = vadd.f32 %v1334_v30, %v3507_v41 }
 0x184   :  { %v1351_v0 = vadd.f32 %v1335_v63, %v3508_v1  ;;  %v1352_v60 = vadd.f32 %v1336_v5, %v3509_v56  ;;  %v1353_v14 = vadd.f32 %v1337_v3, %v3510_v61  ;;  %v1358_v16 = vadd.f32 %v3511_v50, %v1338_v48 }
 0x185   :  { %v1359_v38 = vadd.f32 %v3511_v50, %v1339_v34  ;;  %v1360_v47 = vadd.f32 %v3511_v50, %v1340_v51  ;;  %v1361_v62 = vadd.f32 %v3511_v50, %v1341_v58  ;;  %v1362_v55 = vadd.f32 %v3511_v50, %v1342_v44 }
 0x186   :  { %v1363_v6 = vadd.f32 %v3511_v50, %v1343_v42  ;;  %v1364_v26 = vadd.f32 %v3511_v50, %v1344_v4  ;;  %v1365_v36 = vadd.f32 %v3511_v50, %v1345_v25  ;;  %v1366_v18 = vadd.f32 %v3511_v50, %v1346_v49  ;;  %1374 = vst [vmem:[#allocation8] sm:$0xff] %v1358_v16 }
 0x187   :  { %v1367_v24 = vadd.f32 %v3511_v50, %v1347_v20  ;;  %v1368_v21 = vadd.f32 %v3511_v50, %v1348_v57  ;;  %v1369_v22 = vadd.f32 %v3511_v50, %v1349_v13  ;;  %1375 = vst [vmem:[#allocation8 + $0x8] sm:$0xff] %v1359_v38  ;;  %1376 = vst [vmem:[#allocation8 + $0x10] sm:$0xff] %v1360_v47 }
 0x188   :  { %1377 = vst [vmem:[#allocation8 + $0x18] sm:$0xff] %v1361_v62  ;;  %v1370_v53 = vadd.f32 %v3511_v50, %v1350_v37  ;;  %v1371_v45 = vadd.f32 %v3511_v50, %v1351_v0  ;;  %v1372_v59 = vadd.f32 %v3511_v50, %v1352_v60  ;;  %v1373_v43 = vadd.f32 %v3511_v50, %v1353_v14 }
 0x189   :  { %1378 = vst [vmem:[#allocation8 + $0x20] sm:$0xff] %v1362_v55  ;;  %1379 = vst [vmem:[#allocation8 + $0x28] sm:$0xff] %v1363_v6 }
 0x18a   :  { %1380 = vst [vmem:[#allocation8 + $0x30] sm:$0xff] %v1364_v26  ;;  %1381 = vst [vmem:[#allocation8 + $0x38] sm:$0xff] %v1365_v36 }
 0x18b   :  { %1382 = vst [vmem:[#allocation8 + $0x40] sm:$0xff] %v1366_v18  ;;  %1383 = vst [vmem:[#allocation8 + $0x48] sm:$0xff] %v1367_v24 }
 0x18c   :  { %1384 = vst [vmem:[#allocation8 + $0x50] sm:$0xff] %v1368_v21  ;;  %1385 = vst [vmem:[#allocation8 + $0x58] sm:$0xff] %v1369_v22 }
 0x18d   :  { %1386 = vst [vmem:[#allocation8 + $0x60] sm:$0xff] %v1370_v53  ;;  %1387 = vst [vmem:[#allocation8 + $0x68] sm:$0xff] %v1371_v45 }
 0x18e   :  { %1388 = vst [vmem:[#allocation8 + $0x70] sm:$0xff] %v1372_v59  ;;  %1389 = vst [vmem:[#allocation8 + $0x78] sm:$0xff] %v1373_v43 }
 0x18f   :  { %1535 = shalt.err (!%p1532_p6)
}
 0x190   :  { %s1536_s10 = scalar_lea.hbm %s3153_s2, 2048 }
 0x191   :  { %p1537_p7 = scmp.ne.s32.totalorder %s3153_s2, %s1536_s10  ;;  %p1540_p8 = scmp.lt.u32.totalorder %s1536_s10, %s3153_s2 }
 0x193   :  { %p1542_p9 = pnand %p1540_p8, %p1537_p7 }
 0x195   :  { %1545 = shalt.err (!%p1542_p9)
}
 0x196   :  { %1401 = dma.vmem_to_hbm [thread:$0]  %s1396_s6, 2048, %s3153_s2, [#allocation5], %s1553_s19, %s1553_s19, %s1554_s20  }
 0x197   :  { %1550 = dma.done.wait [#allocation5], 2048  }
 0x198   :  { %1551 = vsyncadd [#allocation5], 4294965248 }
 0x199   :  { %1405 = vsyncpa [#allocation4], 1 }
 0x19a   :  { %1406 = vsyncpa [#allocation7], 1 }
 0x19b   :  { %1407 = vsyncpa [#allocation5], 1 }

</bundles_post_ra>
